<compile_context>
chip_gen: v7x
topology: tpu7x:2x2x1
jax: 0.10.0
libtpu: 0.0.40
codegen_flags: <defaults>
</compile_context>

<pallas_src>
import math
import numpy as np
import jax
import jax.numpy as jnp
from jax.experimental import pallas as pl
from jax.experimental.pallas import tpu as pltpu

# ---------------- model hyperparameters (small, forward-consistent) ----------
VOCAB_SIZE = 50
EMBED_SIZE = 32          # == HIDDEN_SIZE so stacked layers share weight shapes
HIDDEN_SIZE = 32
NUM_LAYERS = 2
PAD_IDX = 0
BATCH = 4
SEQ_LEN = 8
B_PAD = 8                # batch padded to the 8-sublane vreg width


# ---------------- Pallas kernel: wavefront GRU (all timesteps, both layers) --
def _make_gru_wavefront_kernel(T, B_pad, E, H, L):
    assert L == 2, "wavefront kernel is specialized for NUM_LAYERS == 2"
    H2, H3 = 2 * H, 3 * H

    def gru_cell(gi, gh, bhn_l, h_prev, m):
        # gi already holds folded r/z biases (bi+bh) and the n input bias.
        rz = jax.nn.sigmoid(gi[:, :H2] + gh[:, :H2])       # one EUP pass over r|z
        r = rz[:, :H]
        z = rz[:, H:]
        n = jnp.tanh(gi[:, H2:] + r * (gh[:, H2:] + bhn_l))
        h_cand = n + z * (h_prev - n)                       # (1-z)*n + z*h_prev
        return h_prev + m * (h_cand - h_prev)               # freeze hidden on padded steps

    def kernel(x_ref, mask_ref, wi0_ref, wbig_ref, bg_ref, bhn_ref, out_ref):
        # ---- hoisted loads: one vld per tensor, reused across the unrolled loop ----
        wi0 = wi0_ref[...]                 # (E, 3H)  bf16, layer-0 input weights r|z|n
        wbig = wbig_ref[...]               # (2H, 9H) bf16, [[Wh0, Wi1, 0],[0, 0, Wh1]]
        bg0 = bg_ref[0]                    # (B_pad, 3H) f32 folded gate biases, layer 0
        bg1 = bg_ref[1]                    # (B_pad, 3H) f32 folded gate biases, layer 1
        bhn0 = bhn_ref[0]                  # (B_pad, H)  f32 b_hn, layer 0
        bhn1 = bhn_ref[1]                  # (B_pad, H)  f32 b_hn, layer 1
        mask = mask_ref[...]               # (B_pad, T*H) f32 {0,1}, lane-dense per step

        # ---- layer-0 input projection for ALL timesteps at once (off serial path) ----
        # TODO(synk): if T grows, stage xg0 in a pltpu.VMEM scratch instead of vregs.
        xg0 = jnp.dot(x_ref[...], wi0, preferred_element_type=jnp.float32)  # (T*B,3H)

        h0 = jnp.zeros((B_pad, H), jnp.float32)     # hidden=None -> zeros
        h1 = jnp.zeros((B_pad, H), jnp.float32)
        outs = []

        # macro-step d=0: layer0 @ t=0 only (h0 == 0 -> gh0 == 0, no matmul needed)
        m0 = mask[:, 0:H]
        gi0 = xg0[0:B_pad, :] + bg0
        h0 = gru_cell(gi0, jnp.zeros((B_pad, H3), jnp.float32), bhn0, h0, m0)

        # macro-steps d=1..T-1: layer0 @ t=d and layer1 @ t=d-1, ONE fused dot each
        for d in range(1, T):                        # static -> fully unrolled
            hh = jnp.concatenate([h0, h1], axis=-1).astype(jnp.bfloat16)   # (B_pad,2H)
            g = jnp.dot(hh, wbig, preferred_element_type=jnp.float32)      # (B_pad,9H)
            gh0 = g[:, :H3]                          # h0 @ Wh0
            gi1 = g[:, H3:2 * H3] + bg1              # h0 @ Wi1  (layer-1 input path)
            gh1 = g[:, 2 * H3:]                      # h1 @ Wh1

            m_d = mask[:, d * H:(d + 1) * H]
            m_p = mask[:, (d - 1) * H:d * H]

            h1_new = gru_cell(gi1, gh1, bhn1, h1, m_p)       # layer1 @ t=d-1
            outs.append(h1_new * m_p)                        # packed-seq: zero padded t

            gi0 = xg0[d * B_pad:(d + 1) * B_pad, :] + bg0
            h0_new = gru_cell(gi0, gh0, bhn0, h0, m_d)       # layer0 @ t=d

            h0, h1 = h0_new, h1_new

        # macro-step d=T: layer1 @ t=T-1 only (reuse fused dot; gh0 columns unused)
        hh = jnp.concatenate([h0, h1], axis=-1).astype(jnp.bfloat16)
        g = jnp.dot(hh, wbig, preferred_element_type=jnp.float32)
        gi1 = g[:, H3:2 * H3] + bg1
        gh1 = g[:, 2 * H3:]
        m_last = mask[:, (T - 1) * H:T * H]
        h1 = gru_cell(gi1, gh1, bhn1, h1, m_last)
        outs.append(h1 * m_last)

        # ---- lane-dense batched stores: (8,128) unmasked chunks + small tail ----
        for c in range(0, T, 4):
            e = min(c + 4, T)
            chunk = outs[c] if e - c == 1 else jnp.concatenate(outs[c:e], axis=-1)
            out_ref[:, c * H:e * H] = chunk
        # final hidden folded into the same output slab (single extra 64-lane store)
        out_ref[:, T * H:] = jnp.concatenate([h0, h1], axis=-1)

    return kernel


def encoder_gru_pallas(x_flat, mask_lanes, Wi0, Wbig, bg, bhn, T, B_pad, E, H, L):
    """x_flat: (T*B_pad, E) bf16 time-major; mask_lanes: (B_pad, T*H) f32 {0,1};
    Wi0: (E, 3H) bf16; Wbig: (2H, 9H) bf16 block [[Wh0,Wi1,0],[0,0,Wh1]];
    bg: (L, B_pad, 3H) f32 folded biases; bhn: (L, B_pad, H) f32.
    Returns slab (B_pad, T*H + L*H): [out_t0..out_t{T-1} | h0_final | h1_final]."""
    kernel = _make_gru_wavefront_kernel(T, B_pad, E, H, L)

    slab = pl.pallas_call(
        kernel,
        out_shape=jax.ShapeDtypeStruct((B_pad, (T + L) * H), jnp.float32),
        grid_spec=pltpu.PrefetchScalarGridSpec(
            num_scalar_prefetch=0,
            grid=(1,),                                         # single invocation, one TC
            in_specs=[
                pl.BlockSpec((T * B_pad, E), lambda i: (0, 0)),        # x (time-major)
                pl.BlockSpec((B_pad, T * H), lambda i: (0, 0)),        # lane-dense mask
                pl.BlockSpec((E, 3 * H), lambda i: (0, 0)),            # W_ih layer 0
                pl.BlockSpec((2 * H, 9 * H), lambda i: (0, 0)),        # wavefront weight
                pl.BlockSpec((L, B_pad, 3 * H), lambda i: (0, 0, 0)),  # folded gate biases
                pl.BlockSpec((L, B_pad, H), lambda i: (0, 0, 0)),      # b_hn
            ],
            out_specs=pl.BlockSpec((B_pad, (T + L) * H), lambda i: (0, 0)),
        ),
        compiler_params=pltpu.CompilerParams(
            dimension_semantics=("arbitrary",),
            vmem_limit_bytes=4 * 1024 * 1024,   # footprint ~100 KB; don't reserve 32 MiB
        ),
    )(x_flat, mask_lanes, Wi0, Wbig, bg, bhn)
    return slab


# ---------------- EncoderRNN forward (glue in plain JAX) ----------------------
def encoder_rnn_forward(params, text_vec, text_lens):
    """text_vec: (B, T) int32 token ids; text_lens: (B,) int32 (sorted desc).
    Returns (output (B,T,H), hidden (L,B,H), attention_mask (B,T) bool)."""
    embedding, wi, wh, bi, bh = params

    embedded = jnp.take(embedding, text_vec, axis=0)          # (B, T, E) embedding lookup
    attention_mask = text_vec != PAD_IDX                      # (B, T)
    # dropout p=0 -> identity

    B, T = text_vec.shape
    E, H, L, B_pad = EMBED_SIZE, HIDDEN_SIZE, NUM_LAYERS, B_PAD

    # pad batch to 8 sublanes (zero rows, zero lengths -> fully masked)
    emb_p = jnp.zeros((B_pad, T, E), jnp.float32).at[:B].set(embedded.astype(jnp.float32))
    lens_p = jnp.zeros((B_pad,), jnp.int32).at[:B].set(text_lens)

    # time-major flattened activations, bf16 MXU operand
    x_flat = jnp.transpose(emb_p, (1, 0, 2)).reshape(T * B_pad, E).astype(jnp.bfloat16)

    # lane-dense validity mask: mask[b, t*H:(t+1)*H] = 1.0 iff t < text_lens[b]
    mask_bt = (jnp.arange(T)[None, :] < lens_p[:, None]).astype(jnp.float32)   # (B_pad,T)
    mask_lanes = jnp.broadcast_to(mask_bt[:, :, None], (B_pad, T, H)).reshape(B_pad, T * H)

    # pack weights: gates r|z|n concatenated along the last dim
    Wi_l = jnp.concatenate([wi[0], wi[1], wi[2]], axis=-1)    # (L, E, 3H)
    Wh_l = jnp.concatenate([wh[0], wh[1], wh[2]], axis=-1)    # (L, H, 3H)
    Wi0 = Wi_l[0].astype(jnp.bfloat16)                        # (E, 3H)

    # wavefront block weight: [h0 | h1] @ [[Wh0, Wi1, 0],[0, 0, Wh1]] = [gh0|gi1|gh1]
    zero = jnp.zeros((H, 3 * H), jnp.float32)
    Wbig = jnp.concatenate([
        jnp.concatenate([Wh_l[0], Wi_l[1], zero], axis=-1),
        jnp.concatenate([zero, zero, Wh_l[1]], axis=-1),
    ], axis=0).astype(jnp.bfloat16)                           # (2H, 9H)

    # pre-fold r/z biases (bi+bh); n keeps bi only (bh_n lives inside r*(...))
    bg = jnp.concatenate([bi[0] + bh[0], bi[1] + bh[1], bi[2]], axis=-1)  # (L, 1, 3H)
    bg = jnp.broadcast_to(bg, (L, B_pad, 3 * H))
    bhn = jnp.broadcast_to(bh[2], (L, B_pad, H))

    slab = encoder_gru_pallas(x_flat, mask_lanes, Wi0, Wbig, bg, bhn, T, B_pad, E, H, L)

    output = slab[:, :T * H].reshape(B_pad, T, H)[:B]                     # (B, T, H)
    hidden = slab[:, T * H:].reshape(B_pad, L, H).transpose(1, 0, 2)[:, :B]  # (L, B, H)
    return output, hidden, attention_mask


# ---------------- pure-JAX reference (for correctness check) -----------------
def encoder_rnn_reference(params, text_vec, text_lens):
    embedding, wi, wh, bi, bh = params
    embedded = jnp.take(embedding, text_vec, axis=0).astype(jnp.float32)
    B, T, E = embedded.shape
    H, L = HIDDEN_SIZE, NUM_LAYERS
    h = jnp.zeros((L, B, H), jnp.float32)
    outs = []
    for t in range(T):
        m = (t < text_lens).astype(jnp.float32)[:, None]
        inp = embedded[:, t]
        new_h = []
        for l in range(L):
            hp = h[l]
            r = jax.nn.sigmoid(inp @ wi[0, l] + bi[0, l] + hp @ wh[0, l] + bh[0, l])
            z = jax.nn.sigmoid(inp @ wi[1, l] + bi[1, l] + hp @ wh[1, l] + bh[1, l])
            n = jnp.tanh(inp @ wi[2, l] + bi[2, l] + r * (hp @ wh[2, l] + bh[2, l]))
            hn = (1.0 - z) * n + z * hp
            hn = m * hn + (1.0 - m) * hp
            new_h.append(hn)
            inp = hn
        h = jnp.stack(new_h)
        outs.append(inp * m)
    return jnp.stack(outs, axis=1), h, (text_vec != PAD_IDX)


# ---------------- deterministic parameter construction -----------------------
def make_params(key):
    H, E, L, V = HIDDEN_SIZE, EMBED_SIZE, NUM_LAYERS, VOCAB_SIZE
    k_emb, k_wi, k_wh, k_bi, k_bh = jax.random.split(key, 5)
    embedding = jax.random.normal(k_emb, (V, E), jnp.float32)
    embedding = embedding.at[PAD_IDX].set(0.0)                # nn.Embedding padding_idx
    bound = 1.0 / math.sqrt(H)                                # PyTorch GRU init range
    wi = jax.random.uniform(k_wi, (3, L, E, H), jnp.float32, -bound, bound)
    wh = jax.random.uniform(k_wh, (3, L, H, H), jnp.float32, -bound, bound)
    bi = jax.random.uniform(k_bi, (3, L, 1, H), jnp.float32, -bound, bound)
    bh = jax.random.uniform(k_bh, (3, L, 1, H), jnp.float32, -bound, bound)
    return (embedding, wi, wh, bi, bh)


if __name__ == "__main__":
    key = jax.random.PRNGKey(0)
    k_params, k_tok = jax.random.split(key)
    params = make_params(k_params)

    # sorted-descending lengths (pack_padded_sequence assumption), pad with PAD_IDX
    text_lens = jnp.array([SEQ_LEN, 6, 5, 3], dtype=jnp.int32)
    tokens = jax.random.randint(k_tok, (BATCH, SEQ_LEN), 1, VOCAB_SIZE, dtype=jnp.int32)
    pos = jnp.arange(SEQ_LEN)[None, :]
    text_vec = jnp.where(pos < text_lens[:, None], tokens, PAD_IDX)

    output, hidden, attn_mask = encoder_rnn_forward(params, text_vec, text_lens)
    jax.block_until_ready((output, hidden, attn_mask))

    # correctness check against pure-JAX f32 reference
    # (tolerance relaxed vs 1e-5 because MXU operands are bf16; accumulation is f32)
    ref_out, ref_hid, ref_mask = encoder_rnn_reference(params, text_vec, text_lens)
    np.testing.assert_allclose(np.asarray(output), np.asarray(ref_out), rtol=2e-2, atol=2e-2)
    np.testing.assert_allclose(np.asarray(hidden), np.asarray(ref_hid), rtol=2e-2, atol=2e-2)
    np.testing.assert_array_equal(np.asarray(attn_mask), np.asarray(ref_mask))

    assert output.shape == (BATCH, SEQ_LEN, HIDDEN_SIZE)
    assert hidden.shape == (NUM_LAYERS, BATCH, HIDDEN_SIZE)
    assert attn_mask.shape == (BATCH, SEQ_LEN)
    print("KERNEL_OK")
</pallas_src>

<mosaic_0001>
module attributes {stable_mosaic.version = 11 : i64} {
  func.func @kernel(%arg0: i32, %arg1: memref<64x32xbf16, #tpu.memory_space<vmem>>, %arg2: memref<8x256xf32, #tpu.memory_space<vmem>>, %arg3: memref<32x96xbf16, #tpu.memory_space<vmem>>, %arg4: memref<64x288xbf16, #tpu.memory_space<vmem>>, %arg5: memref<2x8x96xf32, #tpu.memory_space<vmem>>, %arg6: memref<2x8x32xf32, #tpu.memory_space<vmem>>, %arg7: memref<8x320xf32, #tpu.memory_space<vmem>>) attributes {dimension_semantics = [#tpu.dimension_semantics<arbitrary>], iteration_bounds = array<i64: 1>, scalar_prefetch = 0 : i64, scratch_operands = 0 : i64, tpu.core_type = #tpu.core_type<tc>, window_params = [{pipeline_mode = #tpu.pipeline_mode<synchronous>, transform_indices = @transform_0, window_bounds = array<i64: 64, 32>}, {pipeline_mode = #tpu.pipeline_mode<synchronous>, transform_indices = @transform_1, window_bounds = array<i64: 8, 256>}, {pipeline_mode = #tpu.pipeline_mode<synchronous>, transform_indices = @transform_2, window_bounds = array<i64: 32, 96>}, {pipeline_mode = #tpu.pipeline_mode<synchronous>, transform_indices = @transform_3, window_bounds = array<i64: 64, 288>}, {pipeline_mode = #tpu.pipeline_mode<synchronous>, transform_indices = @transform_4, window_bounds = array<i64: 2, 8, 96>}, {pipeline_mode = #tpu.pipeline_mode<synchronous>, transform_indices = @transform_5, window_bounds = array<i64: 2, 8, 32>}, {pipeline_mode = #tpu.pipeline_mode<synchronous>, transform_indices = @transform_6, window_bounds = array<i64: 8, 320>}]} {
    %c0 = arith.constant 0 : index
    %c0_0 = arith.constant 0 : index
    %0 = vector.load %arg3[%c0, %c0_0] : memref<32x96xbf16, #tpu.memory_space<vmem>>, vector<32x96xbf16>
    %c0_1 = arith.constant 0 : index
    %c0_2 = arith.constant 0 : index
    %1 = vector.load %arg4[%c0_1, %c0_2] : memref<64x288xbf16, #tpu.memory_space<vmem>>, vector<64x288xbf16>
    %c0_3 = arith.constant 0 : index
    %c0_4 = arith.constant 0 : index
    %c0_5 = arith.constant 0 : index
    %2 = vector.load %arg5[%c0_3, %c0_4, %c0_5] : memref<2x8x96xf32, #tpu.memory_space<vmem>>, vector<1x8x96xf32>
    %3 = vector.shape_cast %2 : vector<1x8x96xf32> to vector<8x96xf32>
    %c1 = arith.constant 1 : index
    %c0_6 = arith.constant 0 : index
    %c0_7 = arith.constant 0 : index
    %4 = vector.load %arg5[%c1, %c0_6, %c0_7] : memref<2x8x96xf32, #tpu.memory_space<vmem>>, vector<1x8x96xf32>
    %5 = vector.shape_cast %4 : vector<1x8x96xf32> to vector<8x96xf32>
    %c0_8 = arith.constant 0 : index
    %c0_9 = arith.constant 0 : index
    %c0_10 = arith.constant 0 : index
    %6 = vector.load %arg6[%c0_8, %c0_9, %c0_10] : memref<2x8x32xf32, #tpu.memory_space<vmem>>, vector<1x8x32xf32>
    %7 = vector.shape_cast %6 : vector<1x8x32xf32> to vector<8x32xf32>
    %c1_11 = arith.constant 1 : index
    %c0_12 = arith.constant 0 : index
    %c0_13 = arith.constant 0 : index
    %8 = vector.load %arg6[%c1_11, %c0_12, %c0_13] : memref<2x8x32xf32, #tpu.memory_space<vmem>>, vector<1x8x32xf32>
    %9 = vector.shape_cast %8 : vector<1x8x32xf32> to vector<8x32xf32>
    %c0_14 = arith.constant 0 : index
    %c0_15 = arith.constant 0 : index
    %10 = vector.load %arg2[%c0_14, %c0_15] : memref<8x256xf32, #tpu.memory_space<vmem>>, vector<8x256xf32>
    %c0_16 = arith.constant 0 : index
    %c0_17 = arith.constant 0 : index
    %11 = vector.load %arg1[%c0_16, %c0_17] : memref<64x32xbf16, #tpu.memory_space<vmem>>, vector<64x32xbf16>
    %cst = arith.constant dense<0.000000e+00> : vector<64x96xf32>
    %12 = tpu.matmul %11, %0, %cst {dimension_numbers = #tpu.dot_dimension_numbers<[1], [0], [0], [1], [0, 0, 1, 1], [], []>} : vector<64x32xbf16>, vector<32x96xbf16>, vector<64x96xf32> -> vector<64x96xf32>
    %cst_18 = arith.constant 0.000000e+00 : f32
    %13 = vector.broadcast %cst_18 : f32 to vector<8x32xf32>
    %cst_19 = arith.constant 0.000000e+00 : f32
    %14 = vector.broadcast %cst_19 : f32 to vector<8x32xf32>
    %15 = vector.extract_strided_slice %10 {offsets = [0, 0], sizes = [8, 32], strides = [1, 1]} : vector<8x256xf32> to vector<8x32xf32>
    %16 = vector.extract_strided_slice %12 {offsets = [0, 0], sizes = [8, 96], strides = [1, 1]} : vector<64x96xf32> to vector<8x96xf32>
    %17 = arith.addf %16, %3 : vector<8x96xf32>
    %cst_20 = arith.constant 0.000000e+00 : f32
    %18 = vector.broadcast %cst_20 : f32 to vector<8x96xf32>
    %19 = vector.extract_strided_slice %17 {offsets = [0, 0], sizes = [8, 64], strides = [1, 1]} : vector<8x96xf32> to vector<8x64xf32>
    %20 = vector.extract_strided_slice %18 {offsets = [0, 0], sizes = [8, 64], strides = [1, 1]} : vector<8x96xf32> to vector<8x64xf32>
    %21 = arith.addf %19, %20 : vector<8x64xf32>
    %22 = arith.negf %21 : vector<8x64xf32>
    %23 = math.exp %22 : vector<8x64xf32>
    %cst_21 = arith.constant 1.000000e+00 : f32
    %24 = vector.broadcast %cst_21 : f32 to vector<8x64xf32>
    %25 = arith.addf %24, %23 : vector<8x64xf32>
    %26 = arith.divf %24, %25 : vector<8x64xf32>
    %27 = vector.extract_strided_slice %26 {offsets = [0, 0], sizes = [8, 32], strides = [1, 1]} : vector<8x64xf32> to vector<8x32xf32>
    %28 = vector.extract_strided_slice %26 {offsets = [0, 32], sizes = [8, 32], strides = [1, 1]} : vector<8x64xf32> to vector<8x32xf32>
    %29 = vector.extract_strided_slice %17 {offsets = [0, 64], sizes = [8, 32], strides = [1, 1]} : vector<8x96xf32> to vector<8x32xf32>
    %30 = vector.extract_strided_slice %18 {offsets = [0, 64], sizes = [8, 32], strides = [1, 1]} : vector<8x96xf32> to vector<8x32xf32>
    %31 = arith.addf %30, %7 : vector<8x32xf32>
    %32 = arith.mulf %27, %31 : vector<8x32xf32>
    %33 = arith.addf %29, %32 : vector<8x32xf32>
    %34 = math.tanh %33 : vector<8x32xf32>
    %35 = arith.subf %13, %34 : vector<8x32xf32>
    %36 = arith.mulf %28, %35 : vector<8x32xf32>
    %37 = arith.addf %34, %36 : vector<8x32xf32>
    %38 = arith.subf %37, %13 : vector<8x32xf32>
    %39 = arith.mulf %15, %38 : vector<8x32xf32>
    %40 = arith.addf %13, %39 : vector<8x32xf32>
    %41 = tpu.concatenate %40, %14 in 1 : vector<8x32xf32>, vector<8x32xf32> -> vector<8x64xf32>
    %42 = arith.truncf %41 : vector<8x64xf32> to vector<8x64xbf16>
    %cst_22 = arith.constant dense<0.000000e+00> : vector<8x288xf32>
    %43 = tpu.matmul %42, %1, %cst_22 {dimension_numbers = #tpu.dot_dimension_numbers<[1], [0], [0], [1], [0, 0, 1, 1], [], []>} : vector<8x64xbf16>, vector<64x288xbf16>, vector<8x288xf32> -> vector<8x288xf32>
    %44 = vector.extract_strided_slice %43 {offsets = [0, 0], sizes = [8, 96], strides = [1, 1]} : vector<8x288xf32> to vector<8x96xf32>
    %45 = vector.extract_strided_slice %43 {offsets = [0, 96], sizes = [8, 96], strides = [1, 1]} : vector<8x288xf32> to vector<8x96xf32>
    %46 = arith.addf %45, %5 : vector<8x96xf32>
    %47 = vector.extract_strided_slice %43 {offsets = [0, 192], sizes = [8, 96], strides = [1, 1]} : vector<8x288xf32> to vector<8x96xf32>
    %48 = vector.extract_strided_slice %10 {offsets = [0, 32], sizes = [8, 32], strides = [1, 1]} : vector<8x256xf32> to vector<8x32xf32>
    %49 = vector.extract_strided_slice %10 {offsets = [0, 0], sizes = [8, 32], strides = [1, 1]} : vector<8x256xf32> to vector<8x32xf32>
    %50 = vector.extract_strided_slice %46 {offsets = [0, 0], sizes = [8, 64], strides = [1, 1]} : vector<8x96xf32> to vector<8x64xf32>
    %51 = vector.extract_strided_slice %47 {offsets = [0, 0], sizes = [8, 64], strides = [1, 1]} : vector<8x96xf32> to vector<8x64xf32>
    %52 = arith.addf %50, %51 : vector<8x64xf32>
    %53 = arith.negf %52 : vector<8x64xf32>
    %54 = math.exp %53 : vector<8x64xf32>
    %cst_23 = arith.constant 1.000000e+00 : f32
    %55 = vector.broadcast %cst_23 : f32 to vector<8x64xf32>
    %56 = arith.addf %55, %54 : vector<8x64xf32>
    %57 = arith.divf %55, %56 : vector<8x64xf32>
    %58 = vector.extract_strided_slice %57 {offsets = [0, 0], sizes = [8, 32], strides = [1, 1]} : vector<8x64xf32> to vector<8x32xf32>
    %59 = vector.extract_strided_slice %57 {offsets = [0, 32], sizes = [8, 32], strides = [1, 1]} : vector<8x64xf32> to vector<8x32xf32>
    %60 = vector.extract_strided_slice %46 {offsets = [0, 64], sizes = [8, 32], strides = [1, 1]} : vector<8x96xf32> to vector<8x32xf32>
    %61 = vector.extract_strided_slice %47 {offsets = [0, 64], sizes = [8, 32], strides = [1, 1]} : vector<8x96xf32> to vector<8x32xf32>
    %62 = arith.addf %61, %9 : vector<8x32xf32>
    %63 = arith.mulf %58, %62 : vector<8x32xf32>
    %64 = arith.addf %60, %63 : vector<8x32xf32>
    %65 = math.tanh %64 : vector<8x32xf32>
    %66 = arith.subf %14, %65 : vector<8x32xf32>
    %67 = arith.mulf %59, %66 : vector<8x32xf32>
    %68 = arith.addf %65, %67 : vector<8x32xf32>
    %69 = arith.subf %68, %14 : vector<8x32xf32>
    %70 = arith.mulf %49, %69 : vector<8x32xf32>
    %71 = arith.addf %14, %70 : vector<8x32xf32>
    %72 = arith.mulf %71, %49 : vector<8x32xf32>
    %73 = vector.extract_strided_slice %12 {offsets = [8, 0], sizes = [8, 96], strides = [1, 1]} : vector<64x96xf32> to vector<8x96xf32>
    %74 = arith.addf %73, %3 : vector<8x96xf32>
    %75 = vector.extract_strided_slice %74 {offsets = [0, 0], sizes = [8, 64], strides = [1, 1]} : vector<8x96xf32> to vector<8x64xf32>
    %76 = vector.extract_strided_slice %44 {offsets = [0, 0], sizes = [8, 64], strides = [1, 1]} : vector<8x96xf32> to vector<8x64xf32>
    %77 = arith.addf %75, %76 : vector<8x64xf32>
    %78 = arith.negf %77 : vector<8x64xf32>
    %79 = math.exp %78 : vector<8x64xf32>
    %cst_24 = arith.constant 1.000000e+00 : f32
    %80 = vector.broadcast %cst_24 : f32 to vector<8x64xf32>
    %81 = arith.addf %80, %79 : vector<8x64xf32>
    %82 = arith.divf %80, %81 : vector<8x64xf32>
    %83 = vector.extract_strided_slice %82 {offsets = [0, 0], sizes = [8, 32], strides = [1, 1]} : vector<8x64xf32> to vector<8x32xf32>
    %84 = vector.extract_strided_slice %82 {offsets = [0, 32], sizes = [8, 32], strides = [1, 1]} : vector<8x64xf32> to vector<8x32xf32>
    %85 = vector.extract_strided_slice %74 {offsets = [0, 64], sizes = [8, 32], strides = [1, 1]} : vector<8x96xf32> to vector<8x32xf32>
    %86 = vector.extract_strided_slice %44 {offsets = [0, 64], sizes = [8, 32], strides = [1, 1]} : vector<8x96xf32> to vector<8x32xf32>
    %87 = arith.addf %86, %7 : vector<8x32xf32>
    %88 = arith.mulf %83, %87 : vector<8x32xf32>
    %89 = arith.addf %85, %88 : vector<8x32xf32>
    %90 = math.tanh %89 : vector<8x32xf32>
    %91 = arith.subf %40, %90 : vector<8x32xf32>
    %92 = arith.mulf %84, %91 : vector<8x32xf32>
    %93 = arith.addf %90, %92 : vector<8x32xf32>
    %94 = arith.subf %93, %40 : vector<8x32xf32>
    %95 = arith.mulf %48, %94 : vector<8x32xf32>
    %96 = arith.addf %40, %95 : vector<8x32xf32>
    %97 = tpu.concatenate %96, %71 in 1 : vector<8x32xf32>, vector<8x32xf32> -> vector<8x64xf32>
    %98 = arith.truncf %97 : vector<8x64xf32> to vector<8x64xbf16>
    %cst_25 = arith.constant dense<0.000000e+00> : vector<8x288xf32>
    %99 = tpu.matmul %98, %1, %cst_25 {dimension_numbers = #tpu.dot_dimension_numbers<[1], [0], [0], [1], [0, 0, 1, 1], [], []>} : vector<8x64xbf16>, vector<64x288xbf16>, vector<8x288xf32> -> vector<8x288xf32>
    %100 = vector.extract_strided_slice %99 {offsets = [0, 0], sizes = [8, 96], strides = [1, 1]} : vector<8x288xf32> to vector<8x96xf32>
    %101 = vector.extract_strided_slice %99 {offsets = [0, 96], sizes = [8, 96], strides = [1, 1]} : vector<8x288xf32> to vector<8x96xf32>
    %102 = arith.addf %101, %5 : vector<8x96xf32>
    %103 = vector.extract_strided_slice %99 {offsets = [0, 192], sizes = [8, 96], strides = [1, 1]} : vector<8x288xf32> to vector<8x96xf32>
    %104 = vector.extract_strided_slice %10 {offsets = [0, 64], sizes = [8, 32], strides = [1, 1]} : vector<8x256xf32> to vector<8x32xf32>
    %105 = vector.extract_strided_slice %10 {offsets = [0, 32], sizes = [8, 32], strides = [1, 1]} : vector<8x256xf32> to vector<8x32xf32>
    %106 = vector.extract_strided_slice %102 {offsets = [0, 0], sizes = [8, 64], strides = [1, 1]} : vector<8x96xf32> to vector<8x64xf32>
    %107 = vector.extract_strided_slice %103 {offsets = [0, 0], sizes = [8, 64], strides = [1, 1]} : vector<8x96xf32> to vector<8x64xf32>
    %108 = arith.addf %106, %107 : vector<8x64xf32>
    %109 = arith.negf %108 : vector<8x64xf32>
    %110 = math.exp %109 : vector<8x64xf32>
    %cst_26 = arith.constant 1.000000e+00 : f32
    %111 = vector.broadcast %cst_26 : f32 to vector<8x64xf32>
    %112 = arith.addf %111, %110 : vector<8x64xf32>
    %113 = arith.divf %111, %112 : vector<8x64xf32>
    %114 = vector.extract_strided_slice %113 {offsets = [0, 0], sizes = [8, 32], strides = [1, 1]} : vector<8x64xf32> to vector<8x32xf32>
    %115 = vector.extract_strided_slice %113 {offsets = [0, 32], sizes = [8, 32], strides = [1, 1]} : vector<8x64xf32> to vector<8x32xf32>
    %116 = vector.extract_strided_slice %102 {offsets = [0, 64], sizes = [8, 32], strides = [1, 1]} : vector<8x96xf32> to vector<8x32xf32>
    %117 = vector.extract_strided_slice %103 {offsets = [0, 64], sizes = [8, 32], strides = [1, 1]} : vector<8x96xf32> to vector<8x32xf32>
    %118 = arith.addf %117, %9 : vector<8x32xf32>
    %119 = arith.mulf %114, %118 : vector<8x32xf32>
    %120 = arith.addf %116, %119 : vector<8x32xf32>
    %121 = math.tanh %120 : vector<8x32xf32>
    %122 = arith.subf %71, %121 : vector<8x32xf32>
    %123 = arith.mulf %115, %122 : vector<8x32xf32>
    %124 = arith.addf %121, %123 : vector<8x32xf32>
    %125 = arith.subf %124, %71 : vector<8x32xf32>
    %126 = arith.mulf %105, %125 : vector<8x32xf32>
    %127 = arith.addf %71, %126 : vector<8x32xf32>
    %128 = arith.mulf %127, %105 : vector<8x32xf32>
    %129 = vector.extract_strided_slice %12 {offsets = [16, 0], sizes = [8, 96], strides = [1, 1]} : vector<64x96xf32> to vector<8x96xf32>
    %130 = arith.addf %129, %3 : vector<8x96xf32>
    %131 = vector.extract_strided_slice %130 {offsets = [0, 0], sizes = [8, 64], strides = [1, 1]} : vector<8x96xf32> to vector<8x64xf32>
    %132 = vector.extract_strided_slice %100 {offsets = [0, 0], sizes = [8, 64], strides = [1, 1]} : vector<8x96xf32> to vector<8x64xf32>
    %133 = arith.addf %131, %132 : vector<8x64xf32>
    %134 = arith.negf %133 : vector<8x64xf32>
    %135 = math.exp %134 : vector<8x64xf32>
    %cst_27 = arith.constant 1.000000e+00 : f32
    %136 = vector.broadcast %cst_27 : f32 to vector<8x64xf32>
    %137 = arith.addf %136, %135 : vector<8x64xf32>
    %138 = arith.divf %136, %137 : vector<8x64xf32>
    %139 = vector.extract_strided_slice %138 {offsets = [0, 0], sizes = [8, 32], strides = [1, 1]} : vector<8x64xf32> to vector<8x32xf32>
    %140 = vector.extract_strided_slice %138 {offsets = [0, 32], sizes = [8, 32], strides = [1, 1]} : vector<8x64xf32> to vector<8x32xf32>
    %141 = vector.extract_strided_slice %130 {offsets = [0, 64], sizes = [8, 32], strides = [1, 1]} : vector<8x96xf32> to vector<8x32xf32>
    %142 = vector.extract_strided_slice %100 {offsets = [0, 64], sizes = [8, 32], strides = [1, 1]} : vector<8x96xf32> to vector<8x32xf32>
    %143 = arith.addf %142, %7 : vector<8x32xf32>
    %144 = arith.mulf %139, %143 : vector<8x32xf32>
    %145 = arith.addf %141, %144 : vector<8x32xf32>
    %146 = math.tanh %145 : vector<8x32xf32>
    %147 = arith.subf %96, %146 : vector<8x32xf32>
    %148 = arith.mulf %140, %147 : vector<8x32xf32>
    %149 = arith.addf %146, %148 : vector<8x32xf32>
    %150 = arith.subf %149, %96 : vector<8x32xf32>
    %151 = arith.mulf %104, %150 : vector<8x32xf32>
    %152 = arith.addf %96, %151 : vector<8x32xf32>
    %153 = tpu.concatenate %152, %127 in 1 : vector<8x32xf32>, vector<8x32xf32> -> vector<8x64xf32>
    %154 = arith.truncf %153 : vector<8x64xf32> to vector<8x64xbf16>
    %cst_28 = arith.constant dense<0.000000e+00> : vector<8x288xf32>
    %155 = tpu.matmul %154, %1, %cst_28 {dimension_numbers = #tpu.dot_dimension_numbers<[1], [0], [0], [1], [0, 0, 1, 1], [], []>} : vector<8x64xbf16>, vector<64x288xbf16>, vector<8x288xf32> -> vector<8x288xf32>
    %156 = vector.extract_strided_slice %155 {offsets = [0, 0], sizes = [8, 96], strides = [1, 1]} : vector<8x288xf32> to vector<8x96xf32>
    %157 = vector.extract_strided_slice %155 {offsets = [0, 96], sizes = [8, 96], strides = [1, 1]} : vector<8x288xf32> to vector<8x96xf32>
    %158 = arith.addf %157, %5 : vector<8x96xf32>
    %159 = vector.extract_strided_slice %155 {offsets = [0, 192], sizes = [8, 96], strides = [1, 1]} : vector<8x288xf32> to vector<8x96xf32>
    %160 = vector.extract_strided_slice %10 {offsets = [0, 96], sizes = [8, 32], strides = [1, 1]} : vector<8x256xf32> to vector<8x32xf32>
    %161 = vector.extract_strided_slice %10 {offsets = [0, 64], sizes = [8, 32], strides = [1, 1]} : vector<8x256xf32> to vector<8x32xf32>
    %162 = vector.extract_strided_slice %158 {offsets = [0, 0], sizes = [8, 64], strides = [1, 1]} : vector<8x96xf32> to vector<8x64xf32>
    %163 = vector.extract_strided_slice %159 {offsets = [0, 0], sizes = [8, 64], strides = [1, 1]} : vector<8x96xf32> to vector<8x64xf32>
    %164 = arith.addf %162, %163 : vector<8x64xf32>
    %165 = arith.negf %164 : vector<8x64xf32>
    %166 = math.exp %165 : vector<8x64xf32>
    %cst_29 = arith.constant 1.000000e+00 : f32
    %167 = vector.broadcast %cst_29 : f32 to vector<8x64xf32>
    %168 = arith.addf %167, %166 : vector<8x64xf32>
    %169 = arith.divf %167, %168 : vector<8x64xf32>
    %170 = vector.extract_strided_slice %169 {offsets = [0, 0], sizes = [8, 32], strides = [1, 1]} : vector<8x64xf32> to vector<8x32xf32>
    %171 = vector.extract_strided_slice %169 {offsets = [0, 32], sizes = [8, 32], strides = [1, 1]} : vector<8x64xf32> to vector<8x32xf32>
    %172 = vector.extract_strided_slice %158 {offsets = [0, 64], sizes = [8, 32], strides = [1, 1]} : vector<8x96xf32> to vector<8x32xf32>
    %173 = vector.extract_strided_slice %159 {offsets = [0, 64], sizes = [8, 32], strides = [1, 1]} : vector<8x96xf32> to vector<8x32xf32>
    %174 = arith.addf %173, %9 : vector<8x32xf32>
    %175 = arith.mulf %170, %174 : vector<8x32xf32>
    %176 = arith.addf %172, %175 : vector<8x32xf32>
    %177 = math.tanh %176 : vector<8x32xf32>
    %178 = arith.subf %127, %177 : vector<8x32xf32>
    %179 = arith.mulf %171, %178 : vector<8x32xf32>
    %180 = arith.addf %177, %179 : vector<8x32xf32>
    %181 = arith.subf %180, %127 : vector<8x32xf32>
    %182 = arith.mulf %161, %181 : vector<8x32xf32>
    %183 = arith.addf %127, %182 : vector<8x32xf32>
    %184 = arith.mulf %183, %161 : vector<8x32xf32>
    %185 = vector.extract_strided_slice %12 {offsets = [24, 0], sizes = [8, 96], strides = [1, 1]} : vector<64x96xf32> to vector<8x96xf32>
    %186 = arith.addf %185, %3 : vector<8x96xf32>
    %187 = vector.extract_strided_slice %186 {offsets = [0, 0], sizes = [8, 64], strides = [1, 1]} : vector<8x96xf32> to vector<8x64xf32>
    %188 = vector.extract_strided_slice %156 {offsets = [0, 0], sizes = [8, 64], strides = [1, 1]} : vector<8x96xf32> to vector<8x64xf32>
    %189 = arith.addf %187, %188 : vector<8x64xf32>
    %190 = arith.negf %189 : vector<8x64xf32>
    %191 = math.exp %190 : vector<8x64xf32>
    %cst_30 = arith.constant 1.000000e+00 : f32
    %192 = vector.broadcast %cst_30 : f32 to vector<8x64xf32>
    %193 = arith.addf %192, %191 : vector<8x64xf32>
    %194 = arith.divf %192, %193 : vector<8x64xf32>
    %195 = vector.extract_strided_slice %194 {offsets = [0, 0], sizes = [8, 32], strides = [1, 1]} : vector<8x64xf32> to vector<8x32xf32>
    %196 = vector.extract_strided_slice %194 {offsets = [0, 32], sizes = [8, 32], strides = [1, 1]} : vector<8x64xf32> to vector<8x32xf32>
    %197 = vector.extract_strided_slice %186 {offsets = [0, 64], sizes = [8, 32], strides = [1, 1]} : vector<8x96xf32> to vector<8x32xf32>
    %198 = vector.extract_strided_slice %156 {offsets = [0, 64], sizes = [8, 32], strides = [1, 1]} : vector<8x96xf32> to vector<8x32xf32>
    %199 = arith.addf %198, %7 : vector<8x32xf32>
    %200 = arith.mulf %195, %199 : vector<8x32xf32>
    %201 = arith.addf %197, %200 : vector<8x32xf32>
    %202 = math.tanh %201 : vector<8x32xf32>
    %203 = arith.subf %152, %202 : vector<8x32xf32>
    %204 = arith.mulf %196, %203 : vector<8x32xf32>
    %205 = arith.addf %202, %204 : vector<8x32xf32>
    %206 = arith.subf %205, %152 : vector<8x32xf32>
    %207 = arith.mulf %160, %206 : vector<8x32xf32>
    %208 = arith.addf %152, %207 : vector<8x32xf32>
    %209 = tpu.concatenate %208, %183 in 1 : vector<8x32xf32>, vector<8x32xf32> -> vector<8x64xf32>
    %210 = arith.truncf %209 : vector<8x64xf32> to vector<8x64xbf16>
    %cst_31 = arith.constant dense<0.000000e+00> : vector<8x288xf32>
    %211 = tpu.matmul %210, %1, %cst_31 {dimension_numbers = #tpu.dot_dimension_numbers<[1], [0], [0], [1], [0, 0, 1, 1], [], []>} : vector<8x64xbf16>, vector<64x288xbf16>, vector<8x288xf32> -> vector<8x288xf32>
    %212 = vector.extract_strided_slice %211 {offsets = [0, 0], sizes = [8, 96], strides = [1, 1]} : vector<8x288xf32> to vector<8x96xf32>
    %213 = vector.extract_strided_slice %211 {offsets = [0, 96], sizes = [8, 96], strides = [1, 1]} : vector<8x288xf32> to vector<8x96xf32>
    %214 = arith.addf %213, %5 : vector<8x96xf32>
    %215 = vector.extract_strided_slice %211 {offsets = [0, 192], sizes = [8, 96], strides = [1, 1]} : vector<8x288xf32> to vector<8x96xf32>
    %216 = vector.extract_strided_slice %10 {offsets = [0, 128], sizes = [8, 32], strides = [1, 1]} : vector<8x256xf32> to vector<8x32xf32>
    %217 = vector.extract_strided_slice %10 {offsets = [0, 96], sizes = [8, 32], strides = [1, 1]} : vector<8x256xf32> to vector<8x32xf32>
    %218 = vector.extract_strided_slice %214 {offsets = [0, 0], sizes = [8, 64], strides = [1, 1]} : vector<8x96xf32> to vector<8x64xf32>
    %219 = vector.extract_strided_slice %215 {offsets = [0, 0], sizes = [8, 64], strides = [1, 1]} : vector<8x96xf32> to vector<8x64xf32>
    %220 = arith.addf %218, %219 : vector<8x64xf32>
    %221 = arith.negf %220 : vector<8x64xf32>
    %222 = math.exp %221 : vector<8x64xf32>
    %cst_32 = arith.constant 1.000000e+00 : f32
    %223 = vector.broadcast %cst_32 : f32 to vector<8x64xf32>
    %224 = arith.addf %223, %222 : vector<8x64xf32>
    %225 = arith.divf %223, %224 : vector<8x64xf32>
    %226 = vector.extract_strided_slice %225 {offsets = [0, 0], sizes = [8, 32], strides = [1, 1]} : vector<8x64xf32> to vector<8x32xf32>
    %227 = vector.extract_strided_slice %225 {offsets = [0, 32], sizes = [8, 32], strides = [1, 1]} : vector<8x64xf32> to vector<8x32xf32>
    %228 = vector.extract_strided_slice %214 {offsets = [0, 64], sizes = [8, 32], strides = [1, 1]} : vector<8x96xf32> to vector<8x32xf32>
    %229 = vector.extract_strided_slice %215 {offsets = [0, 64], sizes = [8, 32], strides = [1, 1]} : vector<8x96xf32> to vector<8x32xf32>
    %230 = arith.addf %229, %9 : vector<8x32xf32>
    %231 = arith.mulf %226, %230 : vector<8x32xf32>
    %232 = arith.addf %228, %231 : vector<8x32xf32>
    %233 = math.tanh %232 : vector<8x32xf32>
    %234 = arith.subf %183, %233 : vector<8x32xf32>
    %235 = arith.mulf %227, %234 : vector<8x32xf32>
    %236 = arith.addf %233, %235 : vector<8x32xf32>
    %237 = arith.subf %236, %183 : vector<8x32xf32>
    %238 = arith.mulf %217, %237 : vector<8x32xf32>
    %239 = arith.addf %183, %238 : vector<8x32xf32>
    %240 = arith.mulf %239, %217 : vector<8x32xf32>
    %241 = vector.extract_strided_slice %12 {offsets = [32, 0], sizes = [8, 96], strides = [1, 1]} : vector<64x96xf32> to vector<8x96xf32>
    %242 = arith.addf %241, %3 : vector<8x96xf32>
    %243 = vector.extract_strided_slice %242 {offsets = [0, 0], sizes = [8, 64], strides = [1, 1]} : vector<8x96xf32> to vector<8x64xf32>
    %244 = vector.extract_strided_slice %212 {offsets = [0, 0], sizes = [8, 64], strides = [1, 1]} : vector<8x96xf32> to vector<8x64xf32>
    %245 = arith.addf %243, %244 : vector<8x64xf32>
    %246 = arith.negf %245 : vector<8x64xf32>
    %247 = math.exp %246 : vector<8x64xf32>
    %cst_33 = arith.constant 1.000000e+00 : f32
    %248 = vector.broadcast %cst_33 : f32 to vector<8x64xf32>
    %249 = arith.addf %248, %247 : vector<8x64xf32>
    %250 = arith.divf %248, %249 : vector<8x64xf32>
    %251 = vector.extract_strided_slice %250 {offsets = [0, 0], sizes = [8, 32], strides = [1, 1]} : vector<8x64xf32> to vector<8x32xf32>
    %252 = vector.extract_strided_slice %250 {offsets = [0, 32], sizes = [8, 32], strides = [1, 1]} : vector<8x64xf32> to vector<8x32xf32>
    %253 = vector.extract_strided_slice %242 {offsets = [0, 64], sizes = [8, 32], strides = [1, 1]} : vector<8x96xf32> to vector<8x32xf32>
    %254 = vector.extract_strided_slice %212 {offsets = [0, 64], sizes = [8, 32], strides = [1, 1]} : vector<8x96xf32> to vector<8x32xf32>
    %255 = arith.addf %254, %7 : vector<8x32xf32>
    %256 = arith.mulf %251, %255 : vector<8x32xf32>
    %257 = arith.addf %253, %256 : vector<8x32xf32>
    %258 = math.tanh %257 : vector<8x32xf32>
    %259 = arith.subf %208, %258 : vector<8x32xf32>
    %260 = arith.mulf %252, %259 : vector<8x32xf32>
    %261 = arith.addf %258, %260 : vector<8x32xf32>
    %262 = arith.subf %261, %208 : vector<8x32xf32>
    %263 = arith.mulf %216, %262 : vector<8x32xf32>
    %264 = arith.addf %208, %263 : vector<8x32xf32>
    %265 = tpu.concatenate %264, %239 in 1 : vector<8x32xf32>, vector<8x32xf32> -> vector<8x64xf32>
    %266 = arith.truncf %265 : vector<8x64xf32> to vector<8x64xbf16>
    %cst_34 = arith.constant dense<0.000000e+00> : vector<8x288xf32>
    %267 = tpu.matmul %266, %1, %cst_34 {dimension_numbers = #tpu.dot_dimension_numbers<[1], [0], [0], [1], [0, 0, 1, 1], [], []>} : vector<8x64xbf16>, vector<64x288xbf16>, vector<8x288xf32> -> vector<8x288xf32>
    %268 = vector.extract_strided_slice %267 {offsets = [0, 0], sizes = [8, 96], strides = [1, 1]} : vector<8x288xf32> to vector<8x96xf32>
    %269 = vector.extract_strided_slice %267 {offsets = [0, 96], sizes = [8, 96], strides = [1, 1]} : vector<8x288xf32> to vector<8x96xf32>
    %270 = arith.addf %269, %5 : vector<8x96xf32>
    %271 = vector.extract_strided_slice %267 {offsets = [0, 192], sizes = [8, 96], strides = [1, 1]} : vector<8x288xf32> to vector<8x96xf32>
    %272 = vector.extract_strided_slice %10 {offsets = [0, 160], sizes = [8, 32], strides = [1, 1]} : vector<8x256xf32> to vector<8x32xf32>
    %273 = vector.extract_strided_slice %10 {offsets = [0, 128], sizes = [8, 32], strides = [1, 1]} : vector<8x256xf32> to vector<8x32xf32>
    %274 = vector.extract_strided_slice %270 {offsets = [0, 0], sizes = [8, 64], strides = [1, 1]} : vector<8x96xf32> to vector<8x64xf32>
    %275 = vector.extract_strided_slice %271 {offsets = [0, 0], sizes = [8, 64], strides = [1, 1]} : vector<8x96xf32> to vector<8x64xf32>
    %276 = arith.addf %274, %275 : vector<8x64xf32>
    %277 = arith.negf %276 : vector<8x64xf32>
    %278 = math.exp %277 : vector<8x64xf32>
    %cst_35 = arith.constant 1.000000e+00 : f32
    %279 = vector.broadcast %cst_35 : f32 to vector<8x64xf32>
    %280 = arith.addf %279, %278 : vector<8x64xf32>
    %281 = arith.divf %279, %280 : vector<8x64xf32>
    %282 = vector.extract_strided_slice %281 {offsets = [0, 0], sizes = [8, 32], strides = [1, 1]} : vector<8x64xf32> to vector<8x32xf32>
    %283 = vector.extract_strided_slice %281 {offsets = [0, 32], sizes = [8, 32], strides = [1, 1]} : vector<8x64xf32> to vector<8x32xf32>
    %284 = vector.extract_strided_slice %270 {offsets = [0, 64], sizes = [8, 32], strides = [1, 1]} : vector<8x96xf32> to vector<8x32xf32>
    %285 = vector.extract_strided_slice %271 {offsets = [0, 64], sizes = [8, 32], strides = [1, 1]} : vector<8x96xf32> to vector<8x32xf32>
    %286 = arith.addf %285, %9 : vector<8x32xf32>
    %287 = arith.mulf %282, %286 : vector<8x32xf32>
    %288 = arith.addf %284, %287 : vector<8x32xf32>
    %289 = math.tanh %288 : vector<8x32xf32>
    %290 = arith.subf %239, %289 : vector<8x32xf32>
    %291 = arith.mulf %283, %290 : vector<8x32xf32>
    %292 = arith.addf %289, %291 : vector<8x32xf32>
    %293 = arith.subf %292, %239 : vector<8x32xf32>
    %294 = arith.mulf %273, %293 : vector<8x32xf32>
    %295 = arith.addf %239, %294 : vector<8x32xf32>
    %296 = arith.mulf %295, %273 : vector<8x32xf32>
    %297 = vector.extract_strided_slice %12 {offsets = [40, 0], sizes = [8, 96], strides = [1, 1]} : vector<64x96xf32> to vector<8x96xf32>
    %298 = arith.addf %297, %3 : vector<8x96xf32>
    %299 = vector.extract_strided_slice %298 {offsets = [0, 0], sizes = [8, 64], strides = [1, 1]} : vector<8x96xf32> to vector<8x64xf32>
    %300 = vector.extract_strided_slice %268 {offsets = [0, 0], sizes = [8, 64], strides = [1, 1]} : vector<8x96xf32> to vector<8x64xf32>
    %301 = arith.addf %299, %300 : vector<8x64xf32>
    %302 = arith.negf %301 : vector<8x64xf32>
    %303 = math.exp %302 : vector<8x64xf32>
    %cst_36 = arith.constant 1.000000e+00 : f32
    %304 = vector.broadcast %cst_36 : f32 to vector<8x64xf32>
    %305 = arith.addf %304, %303 : vector<8x64xf32>
    %306 = arith.divf %304, %305 : vector<8x64xf32>
    %307 = vector.extract_strided_slice %306 {offsets = [0, 0], sizes = [8, 32], strides = [1, 1]} : vector<8x64xf32> to vector<8x32xf32>
    %308 = vector.extract_strided_slice %306 {offsets = [0, 32], sizes = [8, 32], strides = [1, 1]} : vector<8x64xf32> to vector<8x32xf32>
    %309 = vector.extract_strided_slice %298 {offsets = [0, 64], sizes = [8, 32], strides = [1, 1]} : vector<8x96xf32> to vector<8x32xf32>
    %310 = vector.extract_strided_slice %268 {offsets = [0, 64], sizes = [8, 32], strides = [1, 1]} : vector<8x96xf32> to vector<8x32xf32>
    %311 = arith.addf %310, %7 : vector<8x32xf32>
    %312 = arith.mulf %307, %311 : vector<8x32xf32>
    %313 = arith.addf %309, %312 : vector<8x32xf32>
    %314 = math.tanh %313 : vector<8x32xf32>
    %315 = arith.subf %264, %314 : vector<8x32xf32>
    %316 = arith.mulf %308, %315 : vector<8x32xf32>
    %317 = arith.addf %314, %316 : vector<8x32xf32>
    %318 = arith.subf %317, %264 : vector<8x32xf32>
    %319 = arith.mulf %272, %318 : vector<8x32xf32>
    %320 = arith.addf %264, %319 : vector<8x32xf32>
    %321 = tpu.concatenate %320, %295 in 1 : vector<8x32xf32>, vector<8x32xf32> -> vector<8x64xf32>
    %322 = arith.truncf %321 : vector<8x64xf32> to vector<8x64xbf16>
    %cst_37 = arith.constant dense<0.000000e+00> : vector<8x288xf32>
    %323 = tpu.matmul %322, %1, %cst_37 {dimension_numbers = #tpu.dot_dimension_numbers<[1], [0], [0], [1], [0, 0, 1, 1], [], []>} : vector<8x64xbf16>, vector<64x288xbf16>, vector<8x288xf32> -> vector<8x288xf32>
    %324 = vector.extract_strided_slice %323 {offsets = [0, 0], sizes = [8, 96], strides = [1, 1]} : vector<8x288xf32> to vector<8x96xf32>
    %325 = vector.extract_strided_slice %323 {offsets = [0, 96], sizes = [8, 96], strides = [1, 1]} : vector<8x288xf32> to vector<8x96xf32>
    %326 = arith.addf %325, %5 : vector<8x96xf32>
    %327 = vector.extract_strided_slice %323 {offsets = [0, 192], sizes = [8, 96], strides = [1, 1]} : vector<8x288xf32> to vector<8x96xf32>
    %328 = vector.extract_strided_slice %10 {offsets = [0, 192], sizes = [8, 32], strides = [1, 1]} : vector<8x256xf32> to vector<8x32xf32>
    %329 = vector.extract_strided_slice %10 {offsets = [0, 160], sizes = [8, 32], strides = [1, 1]} : vector<8x256xf32> to vector<8x32xf32>
    %330 = vector.extract_strided_slice %326 {offsets = [0, 0], sizes = [8, 64], strides = [1, 1]} : vector<8x96xf32> to vector<8x64xf32>
    %331 = vector.extract_strided_slice %327 {offsets = [0, 0], sizes = [8, 64], strides = [1, 1]} : vector<8x96xf32> to vector<8x64xf32>
    %332 = arith.addf %330, %331 : vector<8x64xf32>
    %333 = arith.negf %332 : vector<8x64xf32>
    %334 = math.exp %333 : vector<8x64xf32>
    %cst_38 = arith.constant 1.000000e+00 : f32
    %335 = vector.broadcast %cst_38 : f32 to vector<8x64xf32>
    %336 = arith.addf %335, %334 : vector<8x64xf32>
    %337 = arith.divf %335, %336 : vector<8x64xf32>
    %338 = vector.extract_strided_slice %337 {offsets = [0, 0], sizes = [8, 32], strides = [1, 1]} : vector<8x64xf32> to vector<8x32xf32>
    %339 = vector.extract_strided_slice %337 {offsets = [0, 32], sizes = [8, 32], strides = [1, 1]} : vector<8x64xf32> to vector<8x32xf32>
    %340 = vector.extract_strided_slice %326 {offsets = [0, 64], sizes = [8, 32], strides = [1, 1]} : vector<8x96xf32> to vector<8x32xf32>
    %341 = vector.extract_strided_slice %327 {offsets = [0, 64], sizes = [8, 32], strides = [1, 1]} : vector<8x96xf32> to vector<8x32xf32>
    %342 = arith.addf %341, %9 : vector<8x32xf32>
    %343 = arith.mulf %338, %342 : vector<8x32xf32>
    %344 = arith.addf %340, %343 : vector<8x32xf32>
    %345 = math.tanh %344 : vector<8x32xf32>
    %346 = arith.subf %295, %345 : vector<8x32xf32>
    %347 = arith.mulf %339, %346 : vector<8x32xf32>
    %348 = arith.addf %345, %347 : vector<8x32xf32>
    %349 = arith.subf %348, %295 : vector<8x32xf32>
    %350 = arith.mulf %329, %349 : vector<8x32xf32>
    %351 = arith.addf %295, %350 : vector<8x32xf32>
    %352 = arith.mulf %351, %329 : vector<8x32xf32>
    %353 = vector.extract_strided_slice %12 {offsets = [48, 0], sizes = [8, 96], strides = [1, 1]} : vector<64x96xf32> to vector<8x96xf32>
    %354 = arith.addf %353, %3 : vector<8x96xf32>
    %355 = vector.extract_strided_slice %354 {offsets = [0, 0], sizes = [8, 64], strides = [1, 1]} : vector<8x96xf32> to vector<8x64xf32>
    %356 = vector.extract_strided_slice %324 {offsets = [0, 0], sizes = [8, 64], strides = [1, 1]} : vector<8x96xf32> to vector<8x64xf32>
    %357 = arith.addf %355, %356 : vector<8x64xf32>
    %358 = arith.negf %357 : vector<8x64xf32>
    %359 = math.exp %358 : vector<8x64xf32>
    %cst_39 = arith.constant 1.000000e+00 : f32
    %360 = vector.broadcast %cst_39 : f32 to vector<8x64xf32>
    %361 = arith.addf %360, %359 : vector<8x64xf32>
    %362 = arith.divf %360, %361 : vector<8x64xf32>
    %363 = vector.extract_strided_slice %362 {offsets = [0, 0], sizes = [8, 32], strides = [1, 1]} : vector<8x64xf32> to vector<8x32xf32>
    %364 = vector.extract_strided_slice %362 {offsets = [0, 32], sizes = [8, 32], strides = [1, 1]} : vector<8x64xf32> to vector<8x32xf32>
    %365 = vector.extract_strided_slice %354 {offsets = [0, 64], sizes = [8, 32], strides = [1, 1]} : vector<8x96xf32> to vector<8x32xf32>
    %366 = vector.extract_strided_slice %324 {offsets = [0, 64], sizes = [8, 32], strides = [1, 1]} : vector<8x96xf32> to vector<8x32xf32>
    %367 = arith.addf %366, %7 : vector<8x32xf32>
    %368 = arith.mulf %363, %367 : vector<8x32xf32>
    %369 = arith.addf %365, %368 : vector<8x32xf32>
    %370 = math.tanh %369 : vector<8x32xf32>
    %371 = arith.subf %320, %370 : vector<8x32xf32>
    %372 = arith.mulf %364, %371 : vector<8x32xf32>
    %373 = arith.addf %370, %372 : vector<8x32xf32>
    %374 = arith.subf %373, %320 : vector<8x32xf32>
    %375 = arith.mulf %328, %374 : vector<8x32xf32>
    %376 = arith.addf %320, %375 : vector<8x32xf32>
    %377 = tpu.concatenate %376, %351 in 1 : vector<8x32xf32>, vector<8x32xf32> -> vector<8x64xf32>
    %378 = arith.truncf %377 : vector<8x64xf32> to vector<8x64xbf16>
    %cst_40 = arith.constant dense<0.000000e+00> : vector<8x288xf32>
    %379 = tpu.matmul %378, %1, %cst_40 {dimension_numbers = #tpu.dot_dimension_numbers<[1], [0], [0], [1], [0, 0, 1, 1], [], []>} : vector<8x64xbf16>, vector<64x288xbf16>, vector<8x288xf32> -> vector<8x288xf32>
    %380 = vector.extract_strided_slice %379 {offsets = [0, 0], sizes = [8, 96], strides = [1, 1]} : vector<8x288xf32> to vector<8x96xf32>
    %381 = vector.extract_strided_slice %379 {offsets = [0, 96], sizes = [8, 96], strides = [1, 1]} : vector<8x288xf32> to vector<8x96xf32>
    %382 = arith.addf %381, %5 : vector<8x96xf32>
    %383 = vector.extract_strided_slice %379 {offsets = [0, 192], sizes = [8, 96], strides = [1, 1]} : vector<8x288xf32> to vector<8x96xf32>
    %384 = vector.extract_strided_slice %10 {offsets = [0, 224], sizes = [8, 32], strides = [1, 1]} : vector<8x256xf32> to vector<8x32xf32>
    %385 = vector.extract_strided_slice %10 {offsets = [0, 192], sizes = [8, 32], strides = [1, 1]} : vector<8x256xf32> to vector<8x32xf32>
    %386 = vector.extract_strided_slice %382 {offsets = [0, 0], sizes = [8, 64], strides = [1, 1]} : vector<8x96xf32> to vector<8x64xf32>
    %387 = vector.extract_strided_slice %383 {offsets = [0, 0], sizes = [8, 64], strides = [1, 1]} : vector<8x96xf32> to vector<8x64xf32>
    %388 = arith.addf %386, %387 : vector<8x64xf32>
    %389 = arith.negf %388 : vector<8x64xf32>
    %390 = math.exp %389 : vector<8x64xf32>
    %cst_41 = arith.constant 1.000000e+00 : f32
    %391 = vector.broadcast %cst_41 : f32 to vector<8x64xf32>
    %392 = arith.addf %391, %390 : vector<8x64xf32>
    %393 = arith.divf %391, %392 : vector<8x64xf32>
    %394 = vector.extract_strided_slice %393 {offsets = [0, 0], sizes = [8, 32], strides = [1, 1]} : vector<8x64xf32> to vector<8x32xf32>
    %395 = vector.extract_strided_slice %393 {offsets = [0, 32], sizes = [8, 32], strides = [1, 1]} : vector<8x64xf32> to vector<8x32xf32>
    %396 = vector.extract_strided_slice %382 {offsets = [0, 64], sizes = [8, 32], strides = [1, 1]} : vector<8x96xf32> to vector<8x32xf32>
    %397 = vector.extract_strided_slice %383 {offsets = [0, 64], sizes = [8, 32], strides = [1, 1]} : vector<8x96xf32> to vector<8x32xf32>
    %398 = arith.addf %397, %9 : vector<8x32xf32>
    %399 = arith.mulf %394, %398 : vector<8x32xf32>
    %400 = arith.addf %396, %399 : vector<8x32xf32>
    %401 = math.tanh %400 : vector<8x32xf32>
    %402 = arith.subf %351, %401 : vector<8x32xf32>
    %403 = arith.mulf %395, %402 : vector<8x32xf32>
    %404 = arith.addf %401, %403 : vector<8x32xf32>
    %405 = arith.subf %404, %351 : vector<8x32xf32>
    %406 = arith.mulf %385, %405 : vector<8x32xf32>
    %407 = arith.addf %351, %406 : vector<8x32xf32>
    %408 = arith.mulf %407, %385 : vector<8x32xf32>
    %409 = vector.extract_strided_slice %12 {offsets = [56, 0], sizes = [8, 96], strides = [1, 1]} : vector<64x96xf32> to vector<8x96xf32>
    %410 = arith.addf %409, %3 : vector<8x96xf32>
    %411 = vector.extract_strided_slice %410 {offsets = [0, 0], sizes = [8, 64], strides = [1, 1]} : vector<8x96xf32> to vector<8x64xf32>
    %412 = vector.extract_strided_slice %380 {offsets = [0, 0], sizes = [8, 64], strides = [1, 1]} : vector<8x96xf32> to vector<8x64xf32>
    %413 = arith.addf %411, %412 : vector<8x64xf32>
    %414 = arith.negf %413 : vector<8x64xf32>
    %415 = math.exp %414 : vector<8x64xf32>
    %cst_42 = arith.constant 1.000000e+00 : f32
    %416 = vector.broadcast %cst_42 : f32 to vector<8x64xf32>
    %417 = arith.addf %416, %415 : vector<8x64xf32>
    %418 = arith.divf %416, %417 : vector<8x64xf32>
    %419 = vector.extract_strided_slice %418 {offsets = [0, 0], sizes = [8, 32], strides = [1, 1]} : vector<8x64xf32> to vector<8x32xf32>
    %420 = vector.extract_strided_slice %418 {offsets = [0, 32], sizes = [8, 32], strides = [1, 1]} : vector<8x64xf32> to vector<8x32xf32>
    %421 = vector.extract_strided_slice %410 {offsets = [0, 64], sizes = [8, 32], strides = [1, 1]} : vector<8x96xf32> to vector<8x32xf32>
    %422 = vector.extract_strided_slice %380 {offsets = [0, 64], sizes = [8, 32], strides = [1, 1]} : vector<8x96xf32> to vector<8x32xf32>
    %423 = arith.addf %422, %7 : vector<8x32xf32>
    %424 = arith.mulf %419, %423 : vector<8x32xf32>
    %425 = arith.addf %421, %424 : vector<8x32xf32>
    %426 = math.tanh %425 : vector<8x32xf32>
    %427 = arith.subf %376, %426 : vector<8x32xf32>
    %428 = arith.mulf %420, %427 : vector<8x32xf32>
    %429 = arith.addf %426, %428 : vector<8x32xf32>
    %430 = arith.subf %429, %376 : vector<8x32xf32>
    %431 = arith.mulf %384, %430 : vector<8x32xf32>
    %432 = arith.addf %376, %431 : vector<8x32xf32>
    %433 = tpu.concatenate %432, %407 in 1 : vector<8x32xf32>, vector<8x32xf32> -> vector<8x64xf32>
    %434 = arith.truncf %433 : vector<8x64xf32> to vector<8x64xbf16>
    %cst_43 = arith.constant dense<0.000000e+00> : vector<8x288xf32>
    %435 = tpu.matmul %434, %1, %cst_43 {dimension_numbers = #tpu.dot_dimension_numbers<[1], [0], [0], [1], [0, 0, 1, 1], [], []>} : vector<8x64xbf16>, vector<64x288xbf16>, vector<8x288xf32> -> vector<8x288xf32>
    %436 = vector.extract_strided_slice %435 {offsets = [0, 96], sizes = [8, 96], strides = [1, 1]} : vector<8x288xf32> to vector<8x96xf32>
    %437 = arith.addf %436, %5 : vector<8x96xf32>
    %438 = vector.extract_strided_slice %435 {offsets = [0, 192], sizes = [8, 96], strides = [1, 1]} : vector<8x288xf32> to vector<8x96xf32>
    %439 = vector.extract_strided_slice %10 {offsets = [0, 224], sizes = [8, 32], strides = [1, 1]} : vector<8x256xf32> to vector<8x32xf32>
    %440 = vector.extract_strided_slice %437 {offsets = [0, 0], sizes = [8, 64], strides = [1, 1]} : vector<8x96xf32> to vector<8x64xf32>
    %441 = vector.extract_strided_slice %438 {offsets = [0, 0], sizes = [8, 64], strides = [1, 1]} : vector<8x96xf32> to vector<8x64xf32>
    %442 = arith.addf %440, %441 : vector<8x64xf32>
    %443 = arith.negf %442 : vector<8x64xf32>
    %444 = math.exp %443 : vector<8x64xf32>
    %cst_44 = arith.constant 1.000000e+00 : f32
    %445 = vector.broadcast %cst_44 : f32 to vector<8x64xf32>
    %446 = arith.addf %445, %444 : vector<8x64xf32>
    %447 = arith.divf %445, %446 : vector<8x64xf32>
    %448 = vector.extract_strided_slice %447 {offsets = [0, 0], sizes = [8, 32], strides = [1, 1]} : vector<8x64xf32> to vector<8x32xf32>
    %449 = vector.extract_strided_slice %447 {offsets = [0, 32], sizes = [8, 32], strides = [1, 1]} : vector<8x64xf32> to vector<8x32xf32>
    %450 = vector.extract_strided_slice %437 {offsets = [0, 64], sizes = [8, 32], strides = [1, 1]} : vector<8x96xf32> to vector<8x32xf32>
    %451 = vector.extract_strided_slice %438 {offsets = [0, 64], sizes = [8, 32], strides = [1, 1]} : vector<8x96xf32> to vector<8x32xf32>
    %452 = arith.addf %451, %9 : vector<8x32xf32>
    %453 = arith.mulf %448, %452 : vector<8x32xf32>
    %454 = arith.addf %450, %453 : vector<8x32xf32>
    %455 = math.tanh %454 : vector<8x32xf32>
    %456 = arith.subf %407, %455 : vector<8x32xf32>
    %457 = arith.mulf %449, %456 : vector<8x32xf32>
    %458 = arith.addf %455, %457 : vector<8x32xf32>
    %459 = arith.subf %458, %407 : vector<8x32xf32>
    %460 = arith.mulf %439, %459 : vector<8x32xf32>
    %461 = arith.addf %407, %460 : vector<8x32xf32>
    %462 = arith.mulf %461, %439 : vector<8x32xf32>
    %463 = tpu.concatenate %72, %128, %184, %240 in 1 : vector<8x32xf32>, vector<8x32xf32>, vector<8x32xf32>, vector<8x32xf32> -> vector<8x128xf32>
    %c0_45 = arith.constant 0 : index
    %c0_46 = arith.constant 0 : index
    %464 = vector.load %arg7[%c0_45, %c0_46] : memref<8x320xf32, #tpu.memory_space<vmem>>, vector<8x128xf32>
    tpu.vector_store %arg7[%c0_45, %c0_46], %463 {strides = array<i32>} : memref<8x320xf32, #tpu.memory_space<vmem>>, vector<8x128xf32>,
    %465 = tpu.concatenate %296, %352, %408, %462 in 1 : vector<8x32xf32>, vector<8x32xf32>, vector<8x32xf32>, vector<8x32xf32> -> vector<8x128xf32>
    %c0_47 = arith.constant 0 : index
    %c128 = arith.constant 128 : index
    %466 = vector.load %arg7[%c0_47, %c128] : memref<8x320xf32, #tpu.memory_space<vmem>>, vector<8x128xf32>
    tpu.vector_store %arg7[%c0_47, %c128], %465 {strides = array<i32>} : memref<8x320xf32, #tpu.memory_space<vmem>>, vector<8x128xf32>,
    %467 = tpu.concatenate %432, %461 in 1 : vector<8x32xf32>, vector<8x32xf32> -> vector<8x64xf32>
    %c0_48 = arith.constant 0 : index
    %c256 = arith.constant 256 : index
    %468 = vector.load %arg7[%c0_48, %c256] : memref<8x320xf32, #tpu.memory_space<vmem>>, vector<8x64xf32>
    tpu.vector_store %arg7[%c0_48, %c256], %467 {strides = array<i32>} : memref<8x320xf32, #tpu.memory_space<vmem>>, vector<8x64xf32>,
    return
  }
  func.func @transform_0(%arg0: i32) -> (i32, i32) {
    %c0_i32 = arith.constant 0 : i32
    %c0_i32_0 = arith.constant 0 : i32
    %c0_i32_1 = arith.constant 0 : i32
    return %c0_i32, %c0_i32_0 : i32, i32
  }
  func.func @transform_1(%arg0: i32) -> (i32, i32) {
    %c0_i32 = arith.constant 0 : i32
    %c0_i32_0 = arith.constant 0 : i32
    %c0_i32_1 = arith.constant 0 : i32
    return %c0_i32, %c0_i32_0 : i32, i32
  }
  func.func @transform_2(%arg0: i32) -> (i32, i32) {
    %c0_i32 = arith.constant 0 : i32
    %c0_i32_0 = arith.constant 0 : i32
    %c0_i32_1 = arith.constant 0 : i32
    return %c0_i32, %c0_i32_0 : i32, i32
  }
  func.func @transform_3(%arg0: i32) -> (i32, i32) {
    %c0_i32 = arith.constant 0 : i32
    %c0_i32_0 = arith.constant 0 : i32
    %c0_i32_1 = arith.constant 0 : i32
    return %c0_i32, %c0_i32_0 : i32, i32
  }
  func.func @transform_4(%arg0: i32) -> (i32, i32, i32) {
    %c0_i32 = arith.constant 0 : i32
    %c0_i32_0 = arith.constant 0 : i32
    %c0_i32_1 = arith.constant 0 : i32
    %c0_i32_2 = arith.constant 0 : i32
    return %c0_i32, %c0_i32_0, %c0_i32_1 : i32, i32, i32
  }
  func.func @transform_5(%arg0: i32) -> (i32, i32, i32) {
    %c0_i32 = arith.constant 0 : i32
    %c0_i32_0 = arith.constant 0 : i32
    %c0_i32_1 = arith.constant 0 : i32
    %c0_i32_2 = arith.constant 0 : i32
    return %c0_i32, %c0_i32_0, %c0_i32_1 : i32, i32, i32
  }
  func.func @transform_6(%arg0: i32) -> (i32, i32) {
    %c0_i32 = arith.constant 0 : i32
    %c0_i32_0 = arith.constant 0 : i32
    %c0_i32_1 = arith.constant 0 : i32
    return %c0_i32, %c0_i32_0 : i32, i32
  }
}

</mosaic_0001>

<bundles_post_ra>
// kernel: tpu_custom_call.1
= control target key start
LH: loop header
LB: loop body
LE: loop exit
PB: predicated region body
PF: predicated region fallthrough
CT: control target
= control target key end

     0   :  { %11 = vsyncpa [#allocation3], 0  ;;  %s2969_s0 = inlined_call_operand.vmem [shape: bf16[64,32], index: 0, kind: input, shape index: {}]   ;;  %s2970_s1 = inlined_call_operand.vmem [shape: f32[8,256], index: 1, kind: input, shape index: {}]   ;;  %s2971_s2 = inlined_call_operand.vmem [shape: bf16[32,96], index: 2, kind: input, shape index: {}]   ;;  %s2972_s3 = inlined_call_operand.hbm [shape: bf16[64,288], index: 3, kind: input, shape index: {}]   ;;  %s2973_s4 = inlined_call_operand.vmem [shape: f32[2,8,96], index: 4, kind: input, shape index: {}]   ;;  %s2974_s5 = inlined_call_operand.vmem [shape: f32[2,8,32], index: 5, kind: input, shape index: {}]   ;;  %s2975_s6 = inlined_call_operand.hbm [shape: f32[8,320], index: 6, kind: output, shape index: {}]  }
   0x1   :  { %12 = vsyncpa [#allocation4], 0  ;;  %s2283_s21 = smov [#allocation2]   ;;  %s2235_s25 = scalar_lea.hbm %s2972_s3, 1536 }
   0x2   :  { %s24_s22 = sshll.u32 %s2283_s21, 4  ;;  %p2236_p0 = scmp.ne.s32.totalorder %s2972_s3, %s2235_s25  ;;  %s25_s22 = int_to_ptr.vmem [resolvable:$true] %s24_s22 }
   0x3   :  { %p2239_p1 = scmp.lt.u32.totalorder %s2235_s25, %s2972_s3 }
   0x5   :  { %p2241_p2 = pnand %p2239_p1, %p2236_p0 }
   0x7   :  { %2244 = shalt.err (!%p2241_p2)
}
   0x8   :  { %s2245_s30 = scalar_lea.vmem %s25_s22, 1536  ;;  %p2250_p4 = scmp.lt.s32.totalorder %s25_s22, %s25_s22 }
   0x9   :  { %p2246_p3 = scmp.ne.s32.totalorder %s25_s22, %s2245_s30  ;;  %p2251_p5 = scmp.lt.s32.totalorder %s2245_s30, %s2245_s30 }
   0xb   :  { %p2252_p6 = por %p2251_p5, %p2250_p4 }
   0xd   :  { %p2253_p7 = pnand %p2252_p6, %p2246_p3 }
   0xf   :  { %2256 = shalt.err (!%p2253_p7)
}
  0x10   :  { %s2284_s7 = smov 192   ;;  %s2285_s8 = smov 12  }
  0x11   :  { %30 = dma.hbm_to_vmem [thread:$0]  %s2972_s3, 1536, %s25_s22, [#allocation3], %s2284_s7, %s2284_s7, %s2285_s8  }
  0x12   :  { %2279 = dma.done.wait [#allocation3], 1536  }
  0x13   :  { %2280 = vsyncadd [#allocation3], 4294965760  ;;  %v2070_v0 = vld [vmem:[%s2971_s2] sm:$0xff]   ;;  %v2071_v1 = vld [vmem:[%s2971_s2 + $0x8] sm:$0xff]   ;;  %vm107_vm0 = vcmask 261120   ;;  %s2286_s21 = smov 64  }
  0x14   :  { %1952 = vmatprep.subr.bf16.mxu0 %v2070_v0  ;;  %v2072_v2 = vld [vmem:[%s2969_s0] sm:$0xff]   ;;  %v2073_v3 = vld [vmem:[%s2969_s0 + $0x8] sm:$0xff]   ;;  %s2287_s22 = smov 96   ;;  %v2082_v22 = vld [vmem:[%s2969_s0 + $0x10] sm:$0xff]   ;;  %v2288_v23 = vmov 0.0   ;;  %v2290_v37 = vmov 0  }
  0x15   :  { %1953 = vmatpush3.bf16.msra.mxu0 %v2070_v0  ;;  %1956 = vmatprep.mubr.msk.bf16.mxu0 %vm107_vm0, %v2072_v2  ;;  %v2357_v4 = vld [vmem:[%s2973_s4] sm:$0xff]  ;;  %v2380_v24 = vld [vmem:[#allocation2 + $0x8] ss:$12 sps:$4 sm:$0xff]   ;;  %v2083_v26 = vld [vmem:[%s2969_s0 + $0x18] sm:$0xff]   ;;  %s2289_s0 = smov 32   ;;  %vm2291_vm1 = vmmov 0  }
  0x16   :  { %1954 = vmatprep.subr.bf16.mxu0 %v2071_v1  ;;  %v62_v13 = vld [vmem:[%s2974_s5] sm:$0xff]  ;;  %v2382_v25 = vld [vmem:[#allocation2 + $0x1c] ss:$12 sps:$4 sm:$0xff]   ;;  %v2412_v34 = vld [vmem:[#allocation2 + $0x4c] ss:$12 sps:$4 sm:$0xff]   ;;  %320 = vmatprep.mubr.bf16.mxu1 %v2290_v37  ;;  %vm284_vm2 = vcmask 523264  }
  0x17   :  { %v2372_v20 = vld [vmem:[#allocation2 + $0x4] ss:$12 sps:$4 sm:$0xff]   ;;  %v2374_v21 = vld [vmem:[#allocation2] ss:$12 sps:$4 sm:$0xff]   ;;  %v2414_v35 = vld [vmem:[#allocation2 + $0x48] ss:$12 sps:$4 sm:$0xff]  }
  0x18   :  { %288 = vmatprep.subr.bf16.mxu1 %v2372_v20  ;;  %v2391_v27 = vld [vmem:[#allocation2 + $0x18] ss:$12 sps:$4 sm:$0xff]   ;;  %v2393_v28 = vld [vmem:[#allocation2 + $0x20] ss:$12 sps:$4 sm:$0xff]   ;;  %v2402_v30 = vld [vmem:[#allocation2 + $0x30] ss:$12 sps:$4 sm:$0xff]  }
  0x19   :  { %1955 = vmatpush3.bf16.msra.mxu0 %v2071_v1  ;;  %289 = vmatpush1.bf16.msra.mxu1 %v2374_v21  ;;  %v2397_v29 = vld [vmem:[#allocation2 + $0x34] ss:$12 sps:$4 sm:$0xff]   ;;  %v2406_v32 = vld [vmem:[#allocation2 + $0x38] ss:$12 sps:$4 sm:$0xff]   ;;  %v2416_v36 = vld [vmem:[#allocation2 + $0x50] ss:$12 sps:$4 sm:$0xff]  }
  0x1a   :  { %1964 = vmatprep.subr.bf16.mxu0 %v2288_v23  ;;  %290 = vmatprep.subr.bf16.mxu1 %v2382_v25  ;;  %v1842_v38 = vld [vmem:[%s2973_s4 + $0x8] sm:$0xff]  ;;  %v2442_v45 = vld [vmem:[%s2970_s1] sm:$0xff]  ;;  %vm1802_vm3 = vcmask 785408  }
  0x1b   :  { %v2477_v60 = vld [vmem:[%s2974_s5 + $0x8] sm:$0xff] }
  0x1c   :  { %1957 = vmatmul.mubr.msk.bf16.vlgmr.msra.gmra.mrb[0].mxu0 %vm107_vm0, %v2073_v3 }
  0x1d   :  { %1960 = vmatprep.mubr.msk.bf16.mxu0 %vm107_vm0, %v2082_v22  ;;  %1965 = vmatpush3.bf16.msra.mxu0 %v2380_v24 }
  0x1e   :  { %1966 = vmatprep.subr.bf16.mxu0 %v2288_v23  ;;  %291 = vmatpush1.bf16.msra.mxu1 %v2391_v27 }
  0x1f   :  { %292 = vmatprep.subr.bf16.mxu1 %v2397_v29 }
  0x21   :  { %1967 = vmatpush3.bf16.msra.mxu0 %v2393_v28 }
  0x22   :  { %1968 = vmatprep.subr.bf16.mxu0 %v2288_v23  ;;  %293 = vmatpush1.bf16.msra.mxu1 %v2402_v30 }
  0x23   :  { %294 = vmatprep.subr.bf16.mxu1 %v2412_v34 }
  0x24   :  { %1961 = vmatmul.mubr.msk.bf16.gmra.mrb[4].mxu0 %vm107_vm0, %v2083_v26 }
  0x25   :  { %1969 = vmatpush3.bf16.msra.mxu0 %v2406_v32  ;;  %1972 = vmatprep.mubr.msk.bf16.mxu0 %vm2291_vm1, %v2288_v23 }
  0x26   :  { %1970 = vmatprep.subr.bf16.mxu0 %v2288_v23  ;;  %295 = vmatpush1.bf16.msra.mxu1 %v2414_v35 }
  0x27   :  { %486 = vmatprep.subr.bf16.mxu1 %v2372_v20 }
  0x29   :  { %1971 = vmatpush3.bf16.msra.mxu0 %v2416_v36 }
  0x2a   :  { %1976 = vmatprep.subr.bf16.mxu0 %v2288_v23 }
  0xef   :  { %v2359_v5 = vpop.f32.mrb[0].mxu0 }
  0xf0   :  { %v154_v6 = vpop.f32.mrb[1].mxu0 }
  0xf1   :  { %v185_v7 = vadd.f32 %v154_v6, %v2357_v4  ;;  %v2362_v8 = vpop.f32.mrb[2].mxu0 }
  0xf2   :  { %v2364_v9 = vpop.f32.mrb[3].mxu0 }
  0xf3   :  { %v1854_v10 = vmul.f32 -1.442695, %v185_v7  ;;  %v423_v62 = vadd.f32 %v2364_v9, %v2357_v4 }
  0xf5   :  { %2092 = vpow2.f32 %v1854_v10 }
  0xf7   :  { %v2431_v41 = vpop.f32.mrb[4].mxu0 }
  0xf8   :  { %v2433_v42 = vpop.f32.mrb[5].mxu0 }
  0xf9   :  { %v2435_v43 = vpop.f32.mrb[6].mxu0 }
  0xfa   :  { %v2437_v44 = vpop.f32.mrb[7].mxu0 }
  0xff   :  { %v2093_v11 = vpop.eup %2092 }
 0x100   :  { %v190_v12 = vadd.f32 1.0, %v2093_v11 }
 0x102   :  { %2094 = vrcp.f32 %v190_v12 }
 0x10c   :  { %v2095_v14 = vpop.eup %2094 }
 0x10d   :  { %v194_v15 = vmul.f32 %v2095_v14, %v62_v13 }
 0x10f   :  { %196 = vrot.lane.b32.xlu0 %v194_v15, %s2286_s21 }
 0x181   :  { %v197_v16 = vpop.permute.xlu0 %196 }
 0x182   :  { %v199_v17 = vadd.f32 %v197_v16, %v185_v7 }
 0x184   :  { %2096 = vtanh.f32 %v199_v17 }
 0x18e   :  { %v2097_v18 = vpop.eup %2096 }
 0x18f   :  { %v201_v19 = vsub.f32 0.0, %v2097_v18 }
 0x191   :  { %203 = vrot.lane.b32.xlu0 %v201_v19, %s2287_s22 }
 0x195   :  { %432 = vrot.lane.b32.xlu0 %v62_v13, %s2286_s21 }
 0x199   :  { %370 = vrot.lane.b32.xlu0 %v1842_v38, %s2287_s22 }
 0x203   :  { %v204_v31 = vpop.permute.xlu0 %203 }
 0x204   :  { %v206_v33 = vmul.f32 %v2095_v14, %v204_v31 }
 0x206   :  { %208 = vrot.lane.b32.xlu1 %v206_v33, %s2289_s0 }
 0x207   :  { %v2470_v50 = vpop.permute.xlu0 %432 }
 0x20b   :  { %v2484_v6 = vpop.permute.xlu0 %370 }
 0x278   :  { %v209_v39 = vpop.permute.xlu1 %208 }
 0x279   :  { %v211_v40 = vadd.f32 %v2097_v18, %v209_v39 }
 0x27b   :  { %213 = vrot.lane.b32.xlu1 %v211_v40, %s2286_s21 }
 0x2ed   :  { %v214_v46 = vpop.permute.xlu1 %213 }
 0x2ee   :  { %v2445_v47 = vmul.f32 %v214_v46, %v2442_v45 }
 0x2f0   :  { %v218_v48 = vsel %vm107_vm0, %v2445_v47, 0.0 }
 0x2f1   :  { %v219_v49 = vpack.c.bf16 %v218_v48, %v218_v48 }
 0x2f3   :  { %1867 = vmatmul.mubr.msk.bf16.vlgmr.msra.gmra.mrb[0].mxu1 %vm284_vm2, %v219_v49  ;;  %1973 = vmatmul.mubr.msk.bf16.vlgmr.msra.gmra.mrb[8].mxu0 %vm284_vm2, %v219_v49 }
 0x2f4   :  { %487 = vmatpush1.bf16.msra.mxu1 %v2374_v21  ;;  %1977 = vmatpush3.bf16.msra.mxu0 %v2380_v24 }
 0x2f5   :  { %488 = vmatprep.subr.bf16.mxu1 %v2382_v25  ;;  %1978 = vmatprep.subr.bf16.mxu0 %v2288_v23 }
 0x2f6   :  { %518 = vmatprep.mubr.bf16.mxu1 %v2290_v37  ;;  %1984 = vmatprep.mubr.msk.bf16.mxu0 %vm2291_vm1, %v2288_v23 }
 0x2f8   :  { %489 = vmatpush1.bf16.msra.mxu1 %v2391_v27  ;;  %1979 = vmatpush3.bf16.msra.mxu0 %v2393_v28 }
 0x2f9   :  { %490 = vmatprep.subr.bf16.mxu1 %v2397_v29  ;;  %1980 = vmatprep.subr.bf16.mxu0 %v2288_v23 }
 0x2fc   :  { %491 = vmatpush1.bf16.msra.mxu1 %v2402_v30  ;;  %1981 = vmatpush3.bf16.msra.mxu0 %v2406_v32 }
 0x2fd   :  { %492 = vmatprep.subr.bf16.mxu1 %v2412_v34  ;;  %1982 = vmatprep.subr.bf16.mxu0 %v2288_v23 }
 0x300   :  { %493 = vmatpush1.bf16.msra.mxu1 %v2414_v35  ;;  %1983 = vmatpush3.bf16.msra.mxu0 %v2416_v36 }
 0x301   :  { %677 = vmatprep.subr.bf16.mxu1 %v2372_v20  ;;  %1988 = vmatprep.subr.bf16.mxu0 %v2288_v23 }
 0x3c6   :  { %v322_v51 = vpop.f32.mrb[0].mxu1  ;;  %v363_v52 = vpop.f32.mrb[8].mxu0 }
 0x3c7   :  { %v435_v53 = vadd.f32 %v2470_v50, %v322_v51  ;;  %v324_v54 = vpop.f32.mrb[1].mxu1  ;;  %v1974_v55 = vpop.f32.mrb[9].mxu0  ;;  %v393_v61 = vadd.f32 %v2477_v60, %v363_v52  ;;  %v424_v63 = vadd.f32 %v423_v62, %v322_v51  ;;  %v373_v11 = vadd.f32 %v2484_v6, %v322_v51 }
 0x3c8   :  { %v326_v56 = vpop.f32.mrb[2].mxu1  ;;  %v366_v57 = vpop.f32.mrb[10].mxu0  ;;  %v374_v31 = vadd.f32 %v2484_v6, %v324_v54 }
 0x3c9   :  { %v327_v58 = vpop.f32.mrb[3].mxu1  ;;  %437 = vrot.lane.b32.xlu1 %v435_v53, %s2286_s21  ;;  %v1975_v59 = vpop.f32.mrb[11].mxu0  ;;  %v1871_v0 = vmul.f32 -1.442695, %v424_v63 }
 0x3cb   :  { %2098 = vpow2.f32 %v1871_v0 }
 0x3cd   :  { %376 = vrot.lane.b32.xlu1 %v324_v54, %s2289_s0 }
 0x3d1   :  { %395 = vrot.lane.b32.xlu1 %v393_v61, %s2287_s22 }
 0x3d5   :  { %v2099_v1 = vpop.eup %2098 }
 0x3d6   :  { %v428_v2 = vadd.f32 1.0, %v2099_v1 }
 0x3d8   :  { %2100 = vrcp.f32 %v428_v2 }
 0x3e2   :  { %v2101_v3 = vpop.eup %2100 }
 0x43b   :  { %v438_v7 = vpop.permute.xlu1 %437 }
 0x43c   :  { %v440_v10 = vmul.f32 %v2101_v3, %v438_v7 }
 0x43e   :  { %442 = vrot.lane.b32.xlu0 %v440_v10, %s2286_s21 }
 0x43f   :  { %v377_v12 = vpop.permute.xlu1 %376 }
 0x440   :  { %v379_v13 = vadd.f32 %v377_v12, %v373_v11  ;;  %v380_v49 = vadd.f32 %v377_v12, %v374_v31 }
 0x442   :  { %v1869_v14 = vmul.f32 -1.442695, %v379_v13  ;;  %v1870_v51 = vmul.f32 -1.442695, %v380_v49 }
 0x443   :  { %v396_v17 = vpop.permute.xlu1 %395 }
 0x444   :  { %2102 = vpow2.f32 %v1869_v14 }
 0x44e   :  { %v2103_v9 = vpop.eup %2102 }
 0x44f   :  { %v387_v15 = vadd.f32 1.0, %v2103_v9 }
 0x451   :  { %2104 = vrcp.f32 %v387_v15 }
 0x45b   :  { %v2105_v16 = vpop.eup %2104 }
 0x45c   :  { %v398_v18 = vmul.f32 %v2105_v16, %v396_v17 }
 0x45e   :  { %400 = vrot.lane.b32.xlu0 %v398_v18, %s2286_s21 }
 0x4b0   :  { %v443_v19 = vpop.permute.xlu0 %442 }
 0x4b1   :  { %v445_v22 = vadd.f32 %v443_v19, %v423_v62 }
 0x4b3   :  { %2106 = vtanh.f32 %v445_v22 }
 0x4bd   :  { %v2107_v26 = vpop.eup %2106 }
 0x4be   :  { %448 = vrot.lane.b32.xlu1 %v2107_v26, %s2286_s21 }
 0x4d0   :  { %v401_v33 = vpop.permute.xlu0 %400 }
 0x4d1   :  { %v403_v38 = vadd.f32 %v401_v33, %v374_v31 }
 0x4d3   :  { %2108 = vtanh.f32 %v403_v38  ;;  %v622_v38 = vadd.f32 %v2359_v5, %v2357_v4 }
 0x4d4   :  { %2110 = vpow2.f32 %v1870_v51 }
 0x4dd   :  { %v2109_v39 = vpop.eup %2108 }
 0x4de   :  { %v405_v40 = vsub.f32 0.0, %v2109_v39  ;;  %v2111_v52 = vpop.eup %2110 }
 0x4df   :  { %v388_v53 = vadd.f32 1.0, %v2111_v52 }
 0x4e0   :  { %407 = vrot.lane.b32.xlu1 %v405_v40, %s2287_s22 }
 0x4e1   :  { %2112 = vrcp.f32 %v388_v53 }
 0x4e4   :  { %463 = vrot.lane.b32.xlu1 %v2445_v47, %s2286_s21 }
 0x4eb   :  { %v2113_v57 = vpop.eup %2112 }
 0x530   :  { %v449_v46 = vpop.permute.xlu1 %448 }
 0x531   :  { %v451_v48 = vsub.f32 %v2445_v47, %v449_v46 }
 0x533   :  { %453 = vrot.lane.b32.xlu0 %v451_v48, %s2289_s0 }
 0x552   :  { %v408_v56 = vpop.permute.xlu1 %407 }
 0x553   :  { %v410_v58 = vmul.f32 %v2113_v57, %v408_v56 }
 0x556   :  { %v464_v62 = vpop.permute.xlu1 %463 }
 0x5a5   :  { %v454_v54 = vpop.permute.xlu0 %453 }
 0x5a6   :  { %v456_v55 = vmul.f32 %v2101_v3, %v454_v54 }
 0x5a8   :  { %458 = vrot.lane.b32.xlu0 %v456_v55, %s2289_s0 }
 0x5ac   :  { %412 = vrot.lane.b32.xlu0 %v410_v58, %s2289_s0 }
 0x61a   :  { %v459_v59 = vpop.permute.xlu0 %458 }
 0x61b   :  { %v461_v61 = vadd.f32 %v2107_v26, %v459_v59 }
 0x61d   :  { %v466_v63 = vsub.f32 %v461_v61, %v464_v62 }
 0x61e   :  { %v413_v0 = vpop.permute.xlu0 %412 }
 0x61f   :  { %v415_v1 = vadd.f32 %v2109_v39, %v413_v0  ;;  %468 = vrot.lane.b32.xlu1 %v466_v63, %s2287_s22 }
 0x621   :  { %417 = vrot.lane.b32.xlu0 %v415_v1, %s2287_s22 }
 0x691   :  { %v469_v2 = vpop.permute.xlu1 %468 }
 0x692   :  { %v471_v3 = vmul.f32 %v469_v2, %v2442_v45 }
 0x693   :  { %v418_v7 = vpop.permute.xlu0 %417 }
 0x694   :  { %v2502_v10 = vmul.f32 %v418_v7, %v2442_v45  ;;  %473 = vrot.lane.b32.xlu1 %v471_v3, %s2287_s22 }
 0x696   :  { %478 = vrot.lane.b32.xlu0 %v2502_v10, %s2289_s0 }
 0x706   :  { %v474_v11 = vpop.permute.xlu1 %473 }
 0x707   :  { %v2508_v12 = vadd.f32 %v474_v11, %v2445_v47 }
 0x708   :  { %v2510_v13 = vpop.permute.xlu0 %478 }
 0x709   :  { %v481_v14 = vsel %vm107_vm0, %v2508_v12, %v2510_v13 }
 0x70a   :  { %v482_v9 = vpack.c.bf16 %v481_v14, %v481_v14 }
 0x70c   :  { %1872 = vmatmul.mubr.msk.bf16.vlgmr.msra.gmra.mrb[4].mxu1 %vm284_vm2, %v482_v9  ;;  %1985 = vmatmul.mubr.msk.bf16.vlgmr.msra.gmra.mrb[12].mxu0 %vm284_vm2, %v482_v9 }
 0x70d   :  { %678 = vmatpush1.bf16.msra.mxu1 %v2374_v21  ;;  %1989 = vmatpush3.bf16.msra.mxu0 %v2380_v24 }
 0x70e   :  { %679 = vmatprep.subr.bf16.mxu1 %v2382_v25  ;;  %1990 = vmatprep.subr.bf16.mxu0 %v2288_v23 }
 0x70f   :  { %709 = vmatprep.mubr.bf16.mxu1 %v2290_v37  ;;  %1996 = vmatprep.mubr.msk.bf16.mxu0 %vm2291_vm1, %v2288_v23 }
 0x711   :  { %680 = vmatpush1.bf16.msra.mxu1 %v2391_v27  ;;  %1991 = vmatpush3.bf16.msra.mxu0 %v2393_v28 }
 0x712   :  { %681 = vmatprep.subr.bf16.mxu1 %v2397_v29  ;;  %1992 = vmatprep.subr.bf16.mxu0 %v2288_v23 }
 0x715   :  { %682 = vmatpush1.bf16.msra.mxu1 %v2402_v30  ;;  %1993 = vmatpush3.bf16.msra.mxu0 %v2406_v32 }
 0x716   :  { %683 = vmatprep.subr.bf16.mxu1 %v2412_v34  ;;  %1994 = vmatprep.subr.bf16.mxu0 %v2288_v23 }
 0x719   :  { %684 = vmatpush1.bf16.msra.mxu1 %v2414_v35  ;;  %1995 = vmatpush3.bf16.msra.mxu0 %v2416_v36 }
 0x71a   :  { %875 = vmatprep.subr.bf16.mxu1 %v2372_v20  ;;  %2000 = vmatprep.subr.bf16.mxu0 %v2288_v23 }
 0x7df   :  { %v520_v47 = vpop.f32.mrb[4].mxu1  ;;  %v561_v15 = vpop.f32.mrb[12].mxu0 }
 0x7e0   :  { %v587_v16 = vadd.f32 %v2477_v60, %v561_v15  ;;  %v522_v17 = vpop.f32.mrb[5].mxu1  ;;  %v1986_v18 = vpop.f32.mrb[13].mxu0  ;;  %v630_v33 = vadd.f32 %v520_v47, %v2470_v50  ;;  %v623_v39 = vadd.f32 %v622_v38, %v520_v47  ;;  %v567_v49 = vadd.f32 %v520_v47, %v2484_v6 }
 0x7e1   :  { %570 = vrot.lane.b32.xlu1 %v522_v17, %s2289_s0  ;;  %v524_v19 = vpop.f32.mrb[6].mxu1  ;;  %v564_v22 = vpop.f32.mrb[14].mxu0  ;;  %v568_v1 = vadd.f32 %v522_v17, %v2484_v6 }
 0x7e2   :  { %v525_v26 = vpop.f32.mrb[7].mxu1  ;;  %589 = vrot.lane.b32.xlu0 %v587_v16, %s2287_s22  ;;  %v1987_v31 = vpop.f32.mrb[15].mxu0  ;;  %v1876_v40 = vmul.f32 -1.442695, %v623_v39 }
 0x7e4   :  { %2114 = vpow2.f32 %v1876_v40 }
 0x7e5   :  { %632 = vrot.lane.b32.xlu1 %v630_v33, %s2286_s21 }
 0x7ee   :  { %v2115_v46 = vpop.eup %2114 }
 0x7ef   :  { %v627_v48 = vadd.f32 1.0, %v2115_v46 }
 0x7f1   :  { %2116 = vrcp.f32 %v627_v48 }
 0x7fb   :  { %v2117_v54 = vpop.eup %2116 }
 0x853   :  { %v571_v51 = vpop.permute.xlu1 %570 }
 0x854   :  { %v573_v52 = vadd.f32 %v571_v51, %v567_v49  ;;  %v590_v59 = vpop.permute.xlu0 %589  ;;  %v574_v11 = vadd.f32 %v571_v51, %v568_v1 }
 0x856   :  { %v1874_v53 = vmul.f32 -1.442695, %v573_v52  ;;  %v1875_v14 = vmul.f32 -1.442695, %v574_v11 }
 0x857   :  { %v633_v55 = vpop.permute.xlu1 %632 }
 0x858   :  { %2118 = vpow2.f32 %v1874_v53  ;;  %v635_v56 = vmul.f32 %v2117_v54, %v633_v55 }
 0x85a   :  { %637 = vrot.lane.b32.xlu1 %v635_v56, %s2286_s21 }
 0x862   :  { %v2119_v57 = vpop.eup %2118 }
 0x863   :  { %v581_v58 = vadd.f32 1.0, %v2119_v57 }
 0x865   :  { %2120 = vrcp.f32 %v581_v58 }
 0x86f   :  { %v2121_v5 = vpop.eup %2120 }
 0x870   :  { %v592_v61 = vmul.f32 %v2121_v5, %v590_v59 }
 0x872   :  { %594 = vrot.lane.b32.xlu0 %v592_v61, %s2286_s21 }
 0x8cc   :  { %v638_v62 = vpop.permute.xlu1 %637 }
 0x8cd   :  { %v640_v63 = vadd.f32 %v638_v62, %v622_v38 }
 0x8cf   :  { %2122 = vtanh.f32 %v640_v63 }
 0x8d9   :  { %v2123_v0 = vpop.eup %2122 }
 0x8da   :  { %643 = vrot.lane.b32.xlu1 %v2123_v0, %s2286_s21 }
 0x8e4   :  { %v595_v2 = vpop.permute.xlu0 %594 }
 0x8e5   :  { %v597_v3 = vadd.f32 %v595_v2, %v568_v1 }
 0x8e7   :  { %2124 = vtanh.f32 %v597_v3 }
 0x8e8   :  { %2126 = vpow2.f32 %v1875_v14 }
 0x8f1   :  { %v2125_v7 = vpop.eup %2124 }
 0x8f2   :  { %600 = vrot.lane.b32.xlu0 %v2125_v7, %s2287_s22  ;;  %v2127_v15 = vpop.eup %2126 }
 0x8f3   :  { %v582_v16 = vadd.f32 1.0, %v2127_v15 }
 0x8f5   :  { %2128 = vrcp.f32 %v582_v16 }
 0x8ff   :  { %v2129_v19 = vpop.eup %2128 }
 0x94c   :  { %v644_v9 = vpop.permute.xlu1 %643 }
 0x94d   :  { %v646_v47 = vsub.f32 %v2508_v12, %v644_v9 }
 0x94f   :  { %648 = vrot.lane.b32.xlu0 %v646_v47, %s2289_s0 }
 0x964   :  { %v601_v18 = vpop.permute.xlu0 %600 }
 0x965   :  { %v603_v17 = vsub.f32 %v2502_v10, %v601_v18 }
 0x967   :  { %v604_v22 = vmul.f32 %v2129_v19, %v603_v17 }
 0x969   :  { %606 = vrot.lane.b32.xlu1 %v604_v22, %s2289_s0 }
 0x96d   :  { %658 = vrot.lane.b32.xlu1 %v2508_v12, %s2286_s21 }
 0x9c1   :  { %v649_v26 = vpop.permute.xlu0 %648 }
 0x9c2   :  { %v651_v31 = vmul.f32 %v2117_v54, %v649_v26 }
 0x9c4   :  { %653 = vrot.lane.b32.xlu0 %v651_v31, %s2289_s0 }
 0x9db   :  { %v607_v33 = vpop.permute.xlu1 %606 }
 0x9dc   :  { %v609_v38 = vadd.f32 %v2125_v7, %v607_v33  ;;  %v816_v7 = vadd.f32 %v2362_v8, %v2357_v4 }
 0x9de   :  { %v610_v39 = vsub.f32 %v609_v38, %v2510_v13 }
 0x9df   :  { %v659_v49 = vpop.permute.xlu1 %658 }
 0x9e0   :  { %v611_v40 = vmul.f32 %v610_v39, %v2442_v45 }
 0x9e2   :  { %613 = vrot.lane.b32.xlu0 %v611_v40, %s2287_s22 }
 0xa36   :  { %v654_v46 = vpop.permute.xlu0 %653 }
 0xa37   :  { %v656_v48 = vadd.f32 %v2123_v0, %v654_v46 }
 0xa39   :  { %v661_v51 = vsub.f32 %v656_v48, %v659_v49 }
 0xa3b   :  { %v662_v52 = vmul.f32 %v661_v51, %v2442_v45 }
 0xa3d   :  { %664 = vrot.lane.b32.xlu1 %v662_v52, %s2286_s21 }
 0xa54   :  { %v614_v53 = vpop.permute.xlu0 %613 }
 0xa55   :  { %v2562_v54 = vadd.f32 %v614_v53, %v2502_v10 }
 0xa57   :  { %669 = vrot.lane.b32.xlu0 %v2562_v54, %s2289_s0 }
 0xaaf   :  { %v665_v13 = vpop.permute.xlu1 %664 }
 0xab0   :  { %v2567_v55 = vadd.f32 %v665_v13, %v2508_v12 }
 0xac9   :  { %v2569_v56 = vpop.permute.xlu0 %669 }
 0xaca   :  { %v672_v57 = vsel %vm107_vm0, %v2567_v55, %v2569_v56 }
 0xacb   :  { %v673_v58 = vpack.c.bf16 %v672_v57, %v672_v57 }
 0xacd   :  { %1877 = vmatmul.mubr.msk.bf16.vlgmr.msra.gmra.mrb[8].mxu1 %vm284_vm2, %v673_v58  ;;  %1997 = vmatmul.mubr.msk.bf16.vlgmr.msra.gmra.mrb[16].mxu0 %vm284_vm2, %v673_v58 }
 0xace   :  { %876 = vmatpush1.bf16.msra.mxu1 %v2374_v21  ;;  %2001 = vmatpush3.bf16.msra.mxu0 %v2380_v24 }
 0xacf   :  { %877 = vmatprep.subr.bf16.mxu1 %v2382_v25  ;;  %2002 = vmatprep.subr.bf16.mxu0 %v2288_v23 }
 0xad0   :  { %907 = vmatprep.mubr.bf16.mxu1 %v2290_v37  ;;  %2008 = vmatprep.mubr.msk.bf16.mxu0 %vm2291_vm1, %v2288_v23 }
 0xad2   :  { %878 = vmatpush1.bf16.msra.mxu1 %v2391_v27  ;;  %2003 = vmatpush3.bf16.msra.mxu0 %v2393_v28 }
 0xad3   :  { %879 = vmatprep.subr.bf16.mxu1 %v2397_v29  ;;  %2004 = vmatprep.subr.bf16.mxu0 %v2288_v23 }
 0xad6   :  { %880 = vmatpush1.bf16.msra.mxu1 %v2402_v30  ;;  %2005 = vmatpush3.bf16.msra.mxu0 %v2406_v32 }
 0xad7   :  { %881 = vmatprep.subr.bf16.mxu1 %v2412_v34  ;;  %2006 = vmatprep.subr.bf16.mxu0 %v2288_v23 }
 0xada   :  { %882 = vmatpush1.bf16.msra.mxu1 %v2414_v35  ;;  %2007 = vmatpush3.bf16.msra.mxu0 %v2416_v36 }
 0xadb   :  { %1069 = vmatprep.subr.bf16.mxu1 %v2372_v20  ;;  %2012 = vmatprep.subr.bf16.mxu0 %v2288_v23 }
 0xba0   :  { %v711_v12 = vpop.f32.mrb[8].mxu1  ;;  %v752_v5 = vpop.f32.mrb[16].mxu0 }
 0xba1   :  { %v778_v59 = vadd.f32 %v2477_v60, %v752_v5  ;;  %v713_v61 = vpop.f32.mrb[9].mxu1  ;;  %v1998_v62 = vpop.f32.mrb[17].mxu0  ;;  %v824_v3 = vadd.f32 %v711_v12, %v2470_v50  ;;  %v817_v11 = vadd.f32 %v816_v7, %v711_v12  ;;  %v758_v15 = vadd.f32 %v711_v12, %v2484_v6 }
 0xba2   :  { %761 = vrot.lane.b32.xlu1 %v713_v61, %s2289_s0  ;;  %v715_v63 = vpop.f32.mrb[10].mxu1  ;;  %v755_v0 = vpop.f32.mrb[18].mxu0  ;;  %v759_v49 = vadd.f32 %v713_v61, %v2484_v6 }
 0xba3   :  { %v716_v1 = vpop.f32.mrb[11].mxu1  ;;  %780 = vrot.lane.b32.xlu0 %v778_v59, %s2287_s22  ;;  %v1999_v2 = vpop.f32.mrb[19].mxu0  ;;  %v1881_v14 = vmul.f32 -1.442695, %v817_v11 }
 0xba5   :  { %2130 = vpow2.f32 %v1881_v14 }
 0xba6   :  { %826 = vrot.lane.b32.xlu1 %v824_v3, %s2286_s21 }
 0xbaf   :  { %v2131_v9 = vpop.eup %2130 }
 0xbb0   :  { %v821_v47 = vadd.f32 1.0, %v2131_v9 }
 0xbb2   :  { %2132 = vrcp.f32 %v821_v47 }
 0xbbc   :  { %v2133_v19 = vpop.eup %2132 }
 0xc14   :  { %v762_v16 = vpop.permute.xlu1 %761 }
 0xc15   :  { %v764_v18 = vadd.f32 %v762_v16, %v758_v15  ;;  %v781_v38 = vpop.permute.xlu0 %780  ;;  %v765_v13 = vadd.f32 %v762_v16, %v759_v49 }
 0xc17   :  { %v1879_v17 = vmul.f32 -1.442695, %v764_v18  ;;  %v1880_v57 = vmul.f32 -1.442695, %v765_v13 }
 0xc18   :  { %v827_v22 = vpop.permute.xlu1 %826 }
 0xc19   :  { %2134 = vpow2.f32 %v1879_v17  ;;  %v829_v26 = vmul.f32 %v2133_v19, %v827_v22 }
 0xc1b   :  { %831 = vrot.lane.b32.xlu1 %v829_v26, %s2286_s21 }
 0xc23   :  { %v2135_v31 = vpop.eup %2134 }
 0xc24   :  { %v772_v33 = vadd.f32 1.0, %v2135_v31 }
 0xc26   :  { %2136 = vrcp.f32 %v772_v33 }
 0xc30   :  { %v2137_v8 = vpop.eup %2136 }
 0xc31   :  { %v783_v39 = vmul.f32 %v2137_v8, %v781_v38 }
 0xc33   :  { %785 = vrot.lane.b32.xlu0 %v783_v39, %s2286_s21 }
 0xc8d   :  { %v832_v40 = vpop.permute.xlu1 %831 }
 0xc8e   :  { %v834_v46 = vadd.f32 %v832_v40, %v816_v7 }
 0xc90   :  { %2138 = vtanh.f32 %v834_v46 }
 0xc9a   :  { %v2139_v48 = vpop.eup %2138 }
 0xc9b   :  { %837 = vrot.lane.b32.xlu1 %v2139_v48, %s2286_s21 }
 0xca5   :  { %v786_v51 = vpop.permute.xlu0 %785 }
 0xca6   :  { %v788_v52 = vadd.f32 %v786_v51, %v759_v49 }
 0xca8   :  { %2140 = vtanh.f32 %v788_v52 }
 0xca9   :  { %2142 = vpow2.f32 %v1880_v57  ;;  %v1014_v57 = vadd.f32 %v2433_v42, %v2357_v4 }
 0xcb2   :  { %v2141_v53 = vpop.eup %2140 }
 0xcb3   :  { %791 = vrot.lane.b32.xlu0 %v2141_v53, %s2287_s22  ;;  %v2143_v5 = vpop.eup %2142 }
 0xcb4   :  { %v773_v59 = vadd.f32 1.0, %v2143_v5 }
 0xcb6   :  { %2144 = vrcp.f32 %v773_v59 }
 0xcc0   :  { %v2145_v63 = vpop.eup %2144 }
 0xd0d   :  { %v838_v58 = vpop.permute.xlu1 %837 }
 0xd0e   :  { %v840_v12 = vsub.f32 %v2567_v55, %v838_v58 }
 0xd10   :  { %842 = vrot.lane.b32.xlu0 %v840_v12, %s2289_s0 }
 0xd25   :  { %v792_v62 = vpop.permute.xlu0 %791 }
 0xd26   :  { %v794_v61 = vsub.f32 %v2562_v54, %v792_v62 }
 0xd28   :  { %v795_v0 = vmul.f32 %v2145_v63, %v794_v61 }
 0xd2a   :  { %797 = vrot.lane.b32.xlu1 %v795_v0, %s2289_s0 }
 0xd2e   :  { %852 = vrot.lane.b32.xlu1 %v2567_v55, %s2286_s21 }
 0xd82   :  { %v843_v1 = vpop.permute.xlu0 %842 }
 0xd83   :  { %v845_v2 = vmul.f32 %v2133_v19, %v843_v1 }
 0xd85   :  { %847 = vrot.lane.b32.xlu0 %v845_v2, %s2289_s0 }
 0xd9c   :  { %v798_v3 = vpop.permute.xlu1 %797 }
 0xd9d   :  { %v800_v7 = vadd.f32 %v2141_v53, %v798_v3 }
 0xd9f   :  { %v801_v11 = vsub.f32 %v800_v7, %v2569_v56 }
 0xda0   :  { %v853_v47 = vpop.permute.xlu1 %852 }
 0xda1   :  { %803 = vrot.lane.b32.xlu0 %v801_v11, %s2289_s0 }
 0xdf7   :  { %v848_v14 = vpop.permute.xlu0 %847 }
 0xdf8   :  { %v850_v9 = vadd.f32 %v2139_v48, %v848_v14 }
 0xdfa   :  { %v855_v15 = vsub.f32 %v850_v9, %v853_v47 }
 0xdfc   :  { %857 = vrot.lane.b32.xlu1 %v855_v15, %s2289_s0 }
 0xe13   :  { %v804_v16 = vpop.permute.xlu0 %803 }
 0xe14   :  { %v806_v18 = vmul.f32 %v804_v16, %v2442_v45 }
 0xe16   :  { %808 = vrot.lane.b32.xlu0 %v806_v18, %s2286_s21 }
 0xe6e   :  { %v858_v17 = vpop.permute.xlu1 %857 }
 0xe6f   :  { %v860_v19 = vmul.f32 %v858_v17, %v2442_v45 }
 0xe71   :  { %862 = vrot.lane.b32.xlu1 %v860_v19, %s2289_s0 }
 0xe88   :  { %v809_v22 = vpop.permute.xlu0 %808 }
 0xe89   :  { %v2623_v56 = vadd.f32 %v809_v22, %v2562_v54 }
 0xe8b   :  { %867 = vrot.lane.b32.xlu0 %v2623_v56, %s2289_s0 }
 0xee3   :  { %v863_v26 = vpop.permute.xlu1 %862 }
 0xee4   :  { %v2628_v31 = vadd.f32 %v863_v26, %v2567_v55 }
 0xefd   :  { %v2630_v33 = vpop.permute.xlu0 %867 }
 0xefe   :  { %v870_v8 = vsel %vm107_vm0, %v2628_v31, %v2630_v33 }
 0xeff   :  { %v871_v38 = vpack.c.bf16 %v870_v8, %v870_v8 }
 0xf01   :  { %1882 = vmatmul.mubr.msk.bf16.vlgmr.msra.gmra.mrb[12].mxu1 %vm284_vm2, %v871_v38  ;;  %2009 = vmatmul.mubr.msk.bf16.vlgmr.msra.gmra.mrb[20].mxu0 %vm284_vm2, %v871_v38 }
 0xf02   :  { %1070 = vmatpush1.bf16.msra.mxu1 %v2374_v21  ;;  %2013 = vmatpush3.bf16.msra.mxu0 %v2380_v24 }
 0xf03   :  { %1071 = vmatprep.subr.bf16.mxu1 %v2382_v25  ;;  %2014 = vmatprep.subr.bf16.mxu0 %v2288_v23 }
 0xf04   :  { %1101 = vmatprep.mubr.bf16.mxu1 %v2290_v37  ;;  %2020 = vmatprep.mubr.msk.bf16.mxu0 %vm2291_vm1, %v2288_v23 }
 0xf06   :  { %1072 = vmatpush1.bf16.msra.mxu1 %v2391_v27  ;;  %2015 = vmatpush3.bf16.msra.mxu0 %v2393_v28 }
 0xf07   :  { %1073 = vmatprep.subr.bf16.mxu1 %v2397_v29  ;;  %2016 = vmatprep.subr.bf16.mxu0 %v2288_v23 }
 0xf0a   :  { %1074 = vmatpush1.bf16.msra.mxu1 %v2402_v30  ;;  %2017 = vmatpush3.bf16.msra.mxu0 %v2406_v32 }
 0xf0b   :  { %1075 = vmatprep.subr.bf16.mxu1 %v2412_v34  ;;  %2018 = vmatprep.subr.bf16.mxu0 %v2288_v23 }
 0xf0e   :  { %1076 = vmatpush1.bf16.msra.mxu1 %v2414_v35  ;;  %2019 = vmatpush3.bf16.msra.mxu0 %v2416_v36 }
 0xf0f   :  { %1260 = vmatprep.subr.bf16.mxu1 %v2372_v20  ;;  %2024 = vmatprep.subr.bf16.mxu0 %v2288_v23 }
 0xfd4   :  { %v909_v55 = vpop.f32.mrb[12].mxu1  ;;  %v950_v39 = vpop.f32.mrb[20].mxu0 }
 0xfd5   :  { %v976_v40 = vadd.f32 %v2477_v60, %v950_v39  ;;  %v911_v46 = vpop.f32.mrb[13].mxu1  ;;  %v2010_v48 = vpop.f32.mrb[21].mxu0  ;;  %v1022_v13 = vadd.f32 %v909_v55, %v2470_v50  ;;  %v1015_v58 = vadd.f32 %v1014_v57, %v909_v55  ;;  %v956_v62 = vadd.f32 %v909_v55, %v2484_v6 }
 0xfd6   :  { %959 = vrot.lane.b32.xlu1 %v911_v46, %s2289_s0  ;;  %v913_v49 = vpop.f32.mrb[14].mxu1  ;;  %v953_v51 = vpop.f32.mrb[22].mxu0  ;;  %v957_v16 = vadd.f32 %v911_v46, %v2484_v6 }
 0xfd7   :  { %v914_v52 = vpop.f32.mrb[15].mxu1  ;;  %978 = vrot.lane.b32.xlu0 %v976_v40, %s2287_s22  ;;  %v2011_v53 = vpop.f32.mrb[23].mxu0  ;;  %v1886_v12 = vmul.f32 -1.442695, %v1015_v58 }
 0xfd9   :  { %2146 = vpow2.f32 %v1886_v12 }
 0xfda   :  { %1024 = vrot.lane.b32.xlu1 %v1022_v13, %s2286_s21 }
 0xfe3   :  { %v2147_v5 = vpop.eup %2146 }
 0xfe4   :  { %v1019_v59 = vadd.f32 1.0, %v2147_v5 }
 0xfe6   :  { %2148 = vrcp.f32 %v1019_v59 }
 0xff0   :  { %v2149_v1 = vpop.eup %2148 }
0x1048   :  { %v960_v61 = vpop.permute.xlu1 %959 }
0x1049   :  { %v962_v63 = vadd.f32 %v960_v61, %v956_v62  ;;  %v979_v42 = vpop.permute.xlu0 %978  ;;  %v963_v22 = vadd.f32 %v960_v61, %v957_v16 }
0x104b   :  { %v1884_v0 = vmul.f32 -1.442695, %v962_v63  ;;  %v1885_v26 = vmul.f32 -1.442695, %v963_v22 }
0x104c   :  { %v1025_v2 = vpop.permute.xlu1 %1024 }
0x104d   :  { %2150 = vpow2.f32 %v1884_v0  ;;  %v1027_v3 = vmul.f32 %v2149_v1, %v1025_v2 }
0x104f   :  { %1029 = vrot.lane.b32.xlu1 %v1027_v3, %s2286_s21 }
0x1057   :  { %v2151_v7 = vpop.eup %2150 }
0x1058   :  { %v970_v11 = vadd.f32 1.0, %v2151_v7 }
0x105a   :  { %2152 = vrcp.f32 %v970_v11 }
0x1064   :  { %v2153_v4 = vpop.eup %2152 }
0x1065   :  { %v981_v14 = vmul.f32 %v2153_v4, %v979_v42 }
0x1067   :  { %983 = vrot.lane.b32.xlu0 %v981_v14, %s2286_s21 }
0x10c1   :  { %v1030_v9 = vpop.permute.xlu1 %1029 }
0x10c2   :  { %v1032_v47 = vadd.f32 %v1030_v9, %v1014_v57 }
0x10c4   :  { %2154 = vtanh.f32 %v1032_v47 }
0x10ce   :  { %v2155_v15 = vpop.eup %2154 }
0x10cf   :  { %1035 = vrot.lane.b32.xlu1 %v2155_v15, %s2286_s21 }
0x10d9   :  { %v984_v18 = vpop.permute.xlu0 %983 }
0x10da   :  { %v986_v17 = vadd.f32 %v984_v18, %v957_v16 }
0x10dc   :  { %2156 = vtanh.f32 %v986_v17 }
0x10dd   :  { %2158 = vpow2.f32 %v1885_v26 }
0x10e6   :  { %v2157_v19 = vpop.eup %2156 }
0x10e7   :  { %989 = vrot.lane.b32.xlu0 %v2157_v19, %s2287_s22  ;;  %v2159_v55 = vpop.eup %2158 }
0x10e8   :  { %v971_v39 = vadd.f32 1.0, %v2159_v55 }
0x10ea   :  { %2160 = vrcp.f32 %v971_v39 }
0x10f4   :  { %v2161_v48 = vpop.eup %2160 }
0x1141   :  { %v1036_v8 = vpop.permute.xlu1 %1035 }
0x1142   :  { %v1038_v38 = vsub.f32 %v2628_v31, %v1036_v8 }
0x1144   :  { %1040 = vrot.lane.b32.xlu1 %v1038_v38, %s2289_s0 }
0x1159   :  { %v990_v40 = vpop.permute.xlu0 %989 }
0x115a   :  { %v992_v46 = vsub.f32 %v2623_v56, %v990_v40 }
0x115c   :  { %v993_v49 = vmul.f32 %v2161_v48, %v992_v46 }
0x115e   :  { %995 = vrot.lane.b32.xlu0 %v993_v49, %s2289_s0 }
0x11b6   :  { %v1041_v51 = vpop.permute.xlu1 %1040 }
0x11b7   :  { %v1043_v52 = vmul.f32 %v2149_v1, %v1041_v51 }
0x11b9   :  { %1045 = vrot.lane.b32.xlu1 %v1043_v52, %s2289_s0 }
0x11d0   :  { %v996_v53 = vpop.permute.xlu0 %995 }
0x11d1   :  { %v998_v13 = vadd.f32 %v2157_v19, %v996_v53 }
0x11d3   :  { %v999_v57 = vsub.f32 %v998_v13, %v2630_v33  ;;  %v2689_v33 = vld [vmem:[%s2970_s1 + $0x8] sm:$0xff] }
0x11d5   :  { %1001 = vrot.lane.b32.xlu0 %v999_v57, %s2286_s21 }
0x11d9   :  { %1050 = vrot.lane.b32.xlu0 %v2628_v31, %s2286_s21 }
0x122b   :  { %v1046_v58 = vpop.permute.xlu1 %1045 }
0x122c   :  { %v1048_v59 = vadd.f32 %v2155_v15, %v1046_v58 }
0x1247   :  { %v1002_v12 = vpop.permute.xlu0 %1001 }
0x1248   :  { %v1004_v5 = vmul.f32 %v1002_v12, %v2442_v45 }
0x124a   :  { %1006 = vrot.lane.b32.xlu1 %v1004_v5, %s2289_s0 }
0x124b   :  { %v1051_v62 = vpop.permute.xlu0 %1050 }
0x124c   :  { %v1053_v61 = vsub.f32 %v1048_v59, %v1051_v62 }
0x124e   :  { %1055 = vrot.lane.b32.xlu0 %v1053_v61, %s2286_s21 }
0x12bc   :  { %v1007_v63 = vpop.permute.xlu1 %1006 }
0x12bd   :  { %v2682_v0 = vadd.f32 %v1007_v63, %v2623_v56 }
0x12bf   :  { %1061 = vrot.lane.b32.xlu1 %v2682_v0, %s2289_s0 }
0x12c0   :  { %v1056_v45 = vpop.permute.xlu0 %1055 }
0x12c1   :  { %v1058_v1 = vmul.f32 %v1056_v45, %v2689_v33 }
0x12c3   :  { %v2693_v2 = vadd.f32 %v1058_v1, %v2628_v31 }
0x1331   :  { %v2695_v3 = vpop.permute.xlu1 %1061 }
0x1332   :  { %v1064_v7 = vsel %vm107_vm0, %v2693_v2, %v2695_v3 }
0x1333   :  { %v1065_v11 = vpack.c.bf16 %v1064_v7, %v1064_v7 }
0x1335   :  { %1887 = vmatmul.mubr.msk.bf16.vlgmr.msra.gmra.mrb[16].mxu1 %vm284_vm2, %v1065_v11  ;;  %2021 = vmatmul.mubr.msk.bf16.vlgmr.msra.gmra.mrb[24].mxu0 %vm284_vm2, %v1065_v11 }
0x1336   :  { %1261 = vmatpush1.bf16.msra.mxu1 %v2374_v21  ;;  %2025 = vmatpush3.bf16.msra.mxu0 %v2380_v24 }
0x1337   :  { %1262 = vmatprep.subr.bf16.mxu1 %v2382_v25  ;;  %2026 = vmatprep.subr.bf16.mxu0 %v2288_v23 }
0x1338   :  { %1292 = vmatprep.mubr.bf16.mxu1 %v2290_v37  ;;  %2032 = vmatprep.mubr.msk.bf16.mxu0 %vm2291_vm1, %v2288_v23 }
0x133a   :  { %1263 = vmatpush1.bf16.msra.mxu1 %v2391_v27  ;;  %2027 = vmatpush3.bf16.msra.mxu0 %v2393_v28 }
0x133b   :  { %1264 = vmatprep.subr.bf16.mxu1 %v2397_v29  ;;  %2028 = vmatprep.subr.bf16.mxu0 %v2288_v23 }
0x133e   :  { %1265 = vmatpush1.bf16.msra.mxu1 %v2402_v30  ;;  %2029 = vmatpush3.bf16.msra.mxu0 %v2406_v32 }
0x133f   :  { %1266 = vmatprep.subr.bf16.mxu1 %v2412_v34  ;;  %2030 = vmatprep.subr.bf16.mxu0 %v2288_v23 }
0x1342   :  { %1267 = vmatpush1.bf16.msra.mxu1 %v2414_v35  ;;  %2031 = vmatpush3.bf16.msra.mxu0 %v2416_v36 }
0x1343   :  { %1451 = vmatprep.subr.bf16.mxu1 %v2372_v20  ;;  %2036 = vmatprep.subr.bf16.mxu0 %v2288_v23  ;;  %v2729_v20 = vld [vmem:[%s2973_s4] sm:$0xff] }
0x1344   :  { %v1201_v36 = vadd.f32 %v2729_v20, %v2437_v44 }
0x1408   :  { %v1103_v21 = vpop.f32.mrb[16].mxu1  ;;  %v1144_v24 = vpop.f32.mrb[24].mxu0 }
0x1409   :  { %v1209_v25 = vadd.f32 %v1103_v21, %v2470_v50  ;;  %v1105_v27 = vpop.f32.mrb[17].mxu1  ;;  %v2022_v28 = vpop.f32.mrb[25].mxu0  ;;  %v1170_v35 = vadd.f32 %v2477_v60, %v1144_v24  ;;  %v1202_v31 = vadd.f32 %v1201_v36, %v1103_v21  ;;  %v1150_v9 = vadd.f32 %v1103_v21, %v2484_v6 }
0x140a   :  { %1153 = vrot.lane.b32.xlu1 %v1105_v27, %s2289_s0  ;;  %v1107_v29 = vpop.f32.mrb[18].mxu1  ;;  %v1147_v30 = vpop.f32.mrb[26].mxu0  ;;  %v1151_v40 = vadd.f32 %v1105_v27, %v2484_v6 }
0x140b   :  { %1211 = vrot.lane.b32.xlu0 %v1209_v25, %s2286_s21  ;;  %v1108_v32 = vpop.f32.mrb[19].mxu1  ;;  %v2023_v34 = vpop.f32.mrb[27].mxu0  ;;  %v1891_v4 = vmul.f32 -1.442695, %v1202_v31 }
0x140d   :  { %2162 = vpow2.f32 %v1891_v4  ;;  %v2767_v4 = vld [vmem:[#allocation2] ss:$12 sps:$4 sm:$0xff]  }
0x140f   :  { %1172 = vrot.lane.b32.xlu0 %v1170_v35, %s2287_s22 }
0x1417   :  { %v2163_v42 = vpop.eup %2162 }
0x1418   :  { %v1206_v14 = vadd.f32 1.0, %v2163_v42  ;;  %v2770_v42 = vld [vmem:[#allocation2 + $0x8] ss:$12 sps:$4 sm:$0xff]  }
0x141a   :  { %2164 = vrcp.f32 %v1206_v14  ;;  %v2780_v14 = vld [vmem:[#allocation2 + $0x18] ss:$12 sps:$4 sm:$0xff]  }
0x1424   :  { %v2165_v60 = vpop.eup %2164 }
0x147c   :  { %v1154_v47 = vpop.permute.xlu1 %1153 }
0x147d   :  { %v1156_v15 = vadd.f32 %v1154_v47, %v1150_v9  ;;  %v1212_v16 = vpop.permute.xlu0 %1211  ;;  %v1157_v51 = vadd.f32 %v1154_v47, %v1151_v40  ;;  %v2783_v9 = vld [vmem:[#allocation2 + $0x20] ss:$12 sps:$4 sm:$0xff]  }
0x147e   :  { %v1214_v18 = vmul.f32 %v2165_v60, %v1212_v16  ;;  %v2786_v47 = vld [vmem:[#allocation2 + $0x34] ss:$12 sps:$4 sm:$0xff]   ;;  %v2796_v16 = vld [vmem:[#allocation2 + $0x4c] ss:$12 sps:$4 sm:$0xff]  }
0x147f   :  { %v1889_v17 = vmul.f32 -1.442695, %v1156_v15  ;;  %v1890_v52 = vmul.f32 -1.442695, %v1157_v51  ;;  %v2793_v15 = vld [vmem:[#allocation2 + $0x38] ss:$12 sps:$4 sm:$0xff]   ;;  %v1396_v51 = vadd.f32 %v2729_v20, %v2431_v41 }
0x1480   :  { %1216 = vrot.lane.b32.xlu1 %v1214_v18, %s2286_s21  ;;  %v2800_v18 = vld [vmem:[#allocation2 + $0x48] ss:$12 sps:$4 sm:$0xff]  }
0x1481   :  { %2166 = vpow2.f32 %v1889_v17  ;;  %v1173_v26 = vpop.permute.xlu0 %1172  ;;  %v2803_v17 = vld [vmem:[#allocation2 + $0x50] ss:$12 sps:$4 sm:$0xff]  }
0x148b   :  { %v2167_v19 = vpop.eup %2166 }
0x148c   :  { %v1164_v22 = vadd.f32 1.0, %v2167_v19  ;;  %v2232_v19 = vld [vmem:[#allocation2 + $0x4] ss:$12 sps:$4 sm:$0xff]  }
0x148e   :  { %2168 = vrcp.f32 %v1164_v22 }
0x1498   :  { %v2169_v44 = vpop.eup %2168 }
0x1499   :  { %v1175_v8 = vmul.f32 %v2169_v44, %v1173_v26  ;;  %v2810_v26 = vld [vmem:[%s2974_s5 + $0x8] sm:$0xff] }
0x149b   :  { %1177 = vrot.lane.b32.xlu0 %v1175_v8, %s2286_s21 }
0x14f2   :  { %v1217_v38 = vpop.permute.xlu1 %1216 }
0x14f3   :  { %v1219_v55 = vadd.f32 %v1217_v38, %v1201_v36 }
0x14f5   :  { %2170 = vtanh.f32 %v1219_v55 }
0x14ff   :  { %v2171_v39 = vpop.eup %2170 }
0x1500   :  { %1222 = vrot.lane.b32.xlu1 %v2171_v39, %s2286_s21 }
0x150d   :  { %v1178_v46 = vpop.permute.xlu0 %1177 }
0x150e   :  { %v1180_v48 = vadd.f32 %v1178_v46, %v1151_v40 }
0x1510   :  { %2172 = vtanh.f32 %v1180_v48 }
0x1511   :  { %2174 = vpow2.f32 %v1890_v52 }
0x151a   :  { %v2173_v49 = vpop.eup %2172 }
0x151b   :  { %1183 = vrot.lane.b32.xlu0 %v2173_v49, %s2287_s22  ;;  %v2175_v57 = vpop.eup %2174 }
0x151c   :  { %v1165_v58 = vadd.f32 1.0, %v2175_v57 }
0x151e   :  { %2176 = vrcp.f32 %v1165_v58 }
0x1528   :  { %v2177_v59 = vpop.eup %2176 }
0x1572   :  { %v1223_v53 = vpop.permute.xlu1 %1222 }
0x1573   :  { %v1225_v13 = vsub.f32 %v2693_v2, %v1223_v53 }
0x1575   :  { %1227 = vrot.lane.b32.xlu1 %v1225_v13, %s2289_s0 }
0x158d   :  { %v1184_v12 = vpop.permute.xlu0 %1183 }
0x158e   :  { %v1186_v5 = vsub.f32 %v2682_v0, %v1184_v12 }
0x1590   :  { %v1187_v62 = vmul.f32 %v2177_v59, %v1186_v5 }
0x1592   :  { %1189 = vrot.lane.b32.xlu0 %v1187_v62, %s2289_s0 }
0x1596   :  { %1237 = vrot.lane.b32.xlu0 %v2693_v2, %s2286_s21 }
0x15e7   :  { %v1228_v61 = vpop.permute.xlu1 %1227 }
0x15e8   :  { %v1230_v63 = vmul.f32 %v2165_v60, %v1228_v61  ;;  %v2790_v60 = vld [vmem:[#allocation2 + $0x30] ss:$12 sps:$4 sm:$0xff]  }
0x15ea   :  { %1232 = vrot.lane.b32.xlu1 %v1230_v63, %s2289_s0 }
0x1604   :  { %v1190_v45 = vpop.permute.xlu0 %1189 }
0x1605   :  { %v1192_v1 = vadd.f32 %v2173_v49, %v1190_v45 }
0x1607   :  { %v1193_v7 = vsub.f32 %v1192_v1, %v2695_v3 }
0x1608   :  { %v1238_v24 = vpop.permute.xlu0 %1237 }
0x1609   :  { %1195 = vrot.lane.b32.xlu1 %v1193_v7, %s2287_s22 }
0x165c   :  { %v1233_v11 = vpop.permute.xlu1 %1232 }
0x165d   :  { %v1235_v21 = vadd.f32 %v2171_v39, %v1233_v11 }
0x165f   :  { %v1240_v25 = vsub.f32 %v1235_v21, %v1238_v24 }
0x1661   :  { %1242 = vrot.lane.b32.xlu0 %v1240_v25, %s2287_s22 }
0x167b   :  { %v1196_v27 = vpop.permute.xlu1 %1195 }
0x167c   :  { %v1198_v28 = vmul.f32 %v1196_v27, %v2689_v33 }
0x167e   :  { %v2751_v29 = vadd.f32 %v1198_v28, %v2682_v0 }
0x1680   :  { %1252 = vrot.lane.b32.xlu0 %v2751_v29, %s2289_s0 }
0x16d3   :  { %v1243_v30 = vpop.permute.xlu0 %1242 }
0x16d4   :  { %v1245_v3 = vmul.f32 %v1243_v30, %v2689_v33 }
0x16d6   :  { %1247 = vrot.lane.b32.xlu1 %v1245_v3, %s2287_s22 }
0x16f2   :  { %v2760_v35 = vpop.permute.xlu0 %1252 }
0x1748   :  { %v1248_v32 = vpop.permute.xlu1 %1247 }
0x1749   :  { %v2758_v34 = vadd.f32 %v1248_v32, %v2693_v2  ;;  %v2773_v2 = vld [vmem:[#allocation2 + $0x1c] ss:$12 sps:$4 sm:$0xff]  }
0x174b   :  { %v1255_v36 = vsel %vm107_vm0, %v2758_v34, %v2760_v35 }
0x174c   :  { %v1256_v31 = vpack.c.bf16 %v1255_v36, %v1255_v36 }
0x174e   :  { %1892 = vmatmul.mubr.msk.bf16.vlgmr.msra.gmra.mrb[20].mxu1 %vm284_vm2, %v1256_v31  ;;  %2033 = vmatmul.mubr.msk.bf16.vlgmr.msra.gmra.mrb[28].mxu0 %vm284_vm2, %v1256_v31 }
0x174f   :  { %1452 = vmatpush1.bf16.msra.mxu1 %v2767_v4  ;;  %2037 = vmatpush3.bf16.msra.mxu0 %v2770_v42 }
0x1750   :  { %1453 = vmatprep.subr.bf16.mxu1 %v2773_v2  ;;  %2038 = vmatprep.subr.bf16.mxu0 %v2288_v23 }
0x1751   :  { %1483 = vmatprep.mubr.bf16.mxu1 %v2290_v37  ;;  %2044 = vmatprep.mubr.msk.bf16.mxu0 %vm2291_vm1, %v2288_v23 }
0x1753   :  { %1454 = vmatpush1.bf16.msra.mxu1 %v2780_v14  ;;  %2039 = vmatpush3.bf16.msra.mxu0 %v2783_v9 }
0x1754   :  { %1455 = vmatprep.subr.bf16.mxu1 %v2786_v47  ;;  %2040 = vmatprep.subr.bf16.mxu0 %v2288_v23 }
0x1757   :  { %1456 = vmatpush1.bf16.msra.mxu1 %v2790_v60  ;;  %2041 = vmatpush3.bf16.msra.mxu0 %v2793_v15 }
0x1758   :  { %1457 = vmatprep.subr.bf16.mxu1 %v2796_v16  ;;  %2042 = vmatprep.subr.bf16.mxu0 %v2288_v23 }
0x175b   :  { %1458 = vmatpush1.bf16.msra.mxu1 %v2800_v18  ;;  %2043 = vmatpush3.bf16.msra.mxu0 %v2803_v17 }
0x175c   :  { %1649 = vmatprep.subr.bf16.mxu1 %v2232_v19  ;;  %2048 = vmatprep.subr.bf16.mxu0 %v2288_v23 }
0x1821   :  { %v1294_v22 = vpop.f32.mrb[20].mxu1  ;;  %v1335_v44 = vpop.f32.mrb[28].mxu0 }
0x1822   :  { %v1361_v8 = vadd.f32 %v2810_v26, %v1335_v44  ;;  %v1296_v38 = vpop.f32.mrb[21].mxu1  ;;  %v2034_v55 = vpop.f32.mrb[29].mxu0  ;;  %v1404_v49 = vadd.f32 %v1294_v22, %v2470_v50  ;;  %v1397_v52 = vadd.f32 %v1396_v51, %v1294_v22  ;;  %v1341_v58 = vadd.f32 %v1294_v22, %v2484_v6 }
0x1823   :  { %1344 = vrot.lane.b32.xlu1 %v1296_v38, %s2289_s0  ;;  %v1298_v39 = vpop.f32.mrb[22].mxu1  ;;  %v1338_v40 = vpop.f32.mrb[30].mxu0  ;;  %v1342_v27 = vadd.f32 %v1296_v38, %v2484_v6 }
0x1824   :  { %v1299_v46 = vpop.f32.mrb[23].mxu1  ;;  %1363 = vrot.lane.b32.xlu0 %v1361_v8, %s2287_s22  ;;  %v2035_v48 = vpop.f32.mrb[31].mxu0  ;;  %v1896_v53 = vmul.f32 -1.442695, %v1397_v52 }
0x1826   :  { %2178 = vpow2.f32 %v1896_v53 }
0x1827   :  { %1406 = vrot.lane.b32.xlu1 %v1404_v49, %s2286_s21 }
0x1830   :  { %v2179_v13 = vpop.eup %2178 }
0x1831   :  { %v1401_v57 = vadd.f32 1.0, %v2179_v13 }
0x1833   :  { %2180 = vrcp.f32 %v1401_v57 }
0x183d   :  { %v2181_v62 = vpop.eup %2180 }
0x1895   :  { %v1345_v12 = vpop.permute.xlu1 %1344 }
0x1896   :  { %v1347_v5 = vadd.f32 %v1345_v12, %v1341_v58  ;;  %v1364_v7 = vpop.permute.xlu0 %1363  ;;  %v1348_v32 = vadd.f32 %v1345_v12, %v1342_v27 }
0x1898   :  { %v1894_v59 = vmul.f32 -1.442695, %v1347_v5  ;;  %v1895_v36 = vmul.f32 -1.442695, %v1348_v32 }
0x1899   :  { %v1407_v61 = vpop.permute.xlu1 %1406 }
0x189a   :  { %2182 = vpow2.f32 %v1894_v59  ;;  %v1409_v63 = vmul.f32 %v2181_v62, %v1407_v61 }
0x189c   :  { %1411 = vrot.lane.b32.xlu1 %v1409_v63, %s2286_s21 }
0x18a4   :  { %v2183_v45 = vpop.eup %2182 }
0x18a5   :  { %v1355_v1 = vadd.f32 1.0, %v2183_v45 }
0x18a7   :  { %2184 = vrcp.f32 %v1355_v1 }
0x18b1   :  { %v2185_v41 = vpop.eup %2184 }
0x18b2   :  { %v1366_v11 = vmul.f32 %v2185_v41, %v1364_v7 }
0x18b4   :  { %1368 = vrot.lane.b32.xlu0 %v1366_v11, %s2286_s21 }
0x190e   :  { %v1412_v21 = vpop.permute.xlu1 %1411 }
0x190f   :  { %v1414_v24 = vadd.f32 %v1412_v21, %v1396_v51 }
0x1911   :  { %2186 = vtanh.f32 %v1414_v24 }
0x191b   :  { %v2187_v25 = vpop.eup %2186 }
0x191c   :  { %1417 = vrot.lane.b32.xlu1 %v2187_v25, %s2286_s21 }
0x1926   :  { %v1369_v28 = vpop.permute.xlu0 %1368 }
0x1927   :  { %v1371_v30 = vadd.f32 %v1369_v28, %v1342_v27 }
0x1929   :  { %2188 = vtanh.f32 %v1371_v30 }
0x192a   :  { %2190 = vpow2.f32 %v1895_v36 }
0x1933   :  { %v2189_v3 = vpop.eup %2188 }
0x1934   :  { %1374 = vrot.lane.b32.xlu0 %v2189_v3, %s2287_s22  ;;  %v2191_v22 = vpop.eup %2190 }
0x1935   :  { %v1356_v44 = vadd.f32 1.0, %v2191_v22 }
0x1937   :  { %2192 = vrcp.f32 %v1356_v44 }
0x1941   :  { %v2193_v55 = vpop.eup %2192 }
0x198e   :  { %v1418_v31 = vpop.permute.xlu1 %1417 }
0x198f   :  { %v1420_v19 = vsub.f32 %v2758_v34, %v1418_v31 }
0x1991   :  { %1422 = vrot.lane.b32.xlu0 %v1420_v19, %s2289_s0 }
0x19a6   :  { %v1375_v8 = vpop.permute.xlu0 %1374 }
0x19a7   :  { %v1377_v38 = vsub.f32 %v2751_v29, %v1375_v8 }
0x19a9   :  { %v1378_v39 = vmul.f32 %v2193_v55, %v1377_v38 }
0x19ab   :  { %1380 = vrot.lane.b32.xlu1 %v1378_v39, %s2289_s0 }
0x19af   :  { %1432 = vrot.lane.b32.xlu1 %v2758_v34, %s2286_s21 }
0x1a03   :  { %v1423_v40 = vpop.permute.xlu0 %1422 }
0x1a04   :  { %v1425_v46 = vmul.f32 %v2181_v62, %v1423_v40 }
0x1a06   :  { %1427 = vrot.lane.b32.xlu0 %v1425_v46, %s2289_s0 }
0x1a1d   :  { %v1381_v48 = vpop.permute.xlu1 %1380 }
0x1a1e   :  { %v1383_v49 = vadd.f32 %v2189_v3, %v1381_v48 }
0x1a20   :  { %v1384_v51 = vsub.f32 %v1383_v49, %v2760_v35 }
0x1a21   :  { %v1433_v57 = vpop.permute.xlu1 %1432 }
0x1a22   :  { %v1385_v52 = vmul.f32 %v1384_v51, %v2689_v33 }
0x1a24   :  { %1387 = vrot.lane.b32.xlu0 %v1385_v52, %s2287_s22 }
0x1a78   :  { %v1428_v53 = vpop.permute.xlu0 %1427 }
0x1a79   :  { %v1430_v13 = vadd.f32 %v2187_v25, %v1428_v53 }
0x1a7b   :  { %v1435_v58 = vsub.f32 %v1430_v13, %v1433_v57 }
0x1a7d   :  { %v1436_v12 = vmul.f32 %v1435_v58, %v2689_v33 }
0x1a7f   :  { %1438 = vrot.lane.b32.xlu1 %v1436_v12, %s2286_s21 }
0x1a96   :  { %v1388_v5 = vpop.permute.xlu0 %1387 }
0x1a97   :  { %v2838_v59 = vadd.f32 %v1388_v5, %v2751_v29 }
0x1a99   :  { %1443 = vrot.lane.b32.xlu0 %v2838_v59, %s2289_s0 }
0x1af1   :  { %v1439_v35 = vpop.permute.xlu1 %1438 }
0x1af2   :  { %v2843_v62 = vadd.f32 %v1439_v35, %v2758_v34 }
0x1b0b   :  { %v2845_v61 = vpop.permute.xlu0 %1443 }
0x1b0c   :  { %v1446_v63 = vsel %vm107_vm0, %v2843_v62, %v2845_v61 }
0x1b0d   :  { %v1447_v45 = vpack.c.bf16 %v1446_v63, %v1446_v63 }
0x1b0f   :  { %1897 = vmatmul.mubr.msk.bf16.vlgmr.msra.gmra.mrb[24].mxu1 %vm284_vm2, %v1447_v45  ;;  %2045 = vmatmul.mubr.msk.bf16.vlgmr.msra.gmra.mrb[32].mxu0 %vm284_vm2, %v1447_v45 }
0x1b10   :  { %1650 = vmatpush1.bf16.msra.mxu1 %v2767_v4  ;;  %2049 = vmatpush3.bf16.msra.mxu0 %v2770_v42 }
0x1b11   :  { %1651 = vmatprep.subr.bf16.mxu1 %v2773_v2  ;;  %2050 = vmatprep.subr.bf16.mxu0 %v2288_v23 }
0x1b12   :  { %1681 = vmatprep.mubr.bf16.mxu1 %v2290_v37  ;;  %2056 = vmatprep.mubr.msk.bf16.mxu0 %vm2291_vm1, %v2288_v23 }
0x1b14   :  { %1652 = vmatpush1.bf16.msra.mxu1 %v2780_v14  ;;  %2051 = vmatpush3.bf16.msra.mxu0 %v2783_v9 }
0x1b15   :  { %1653 = vmatprep.subr.bf16.mxu1 %v2786_v47  ;;  %2052 = vmatprep.subr.bf16.mxu0 %v2288_v23 }
0x1b18   :  { %1654 = vmatpush1.bf16.msra.mxu1 %v2790_v60  ;;  %2053 = vmatpush3.bf16.msra.mxu0 %v2793_v15  ;;  %v1590_v15 = vadd.f32 %v2729_v20, %v2435_v43 }
0x1b19   :  { %1655 = vmatprep.subr.bf16.mxu1 %v2796_v16  ;;  %2054 = vmatprep.subr.bf16.mxu0 %v2288_v23 }
0x1b1c   :  { %1656 = vmatpush1.bf16.msra.mxu1 %v2800_v18  ;;  %2055 = vmatpush3.bf16.msra.mxu0 %v2803_v17 }
0x1be2   :  { %v1485_v37 = vpop.f32.mrb[24].mxu1  ;;  %v1526_v34 = vpop.f32.mrb[32].mxu0 }
0x1be3   :  { %v1552_v4 = vadd.f32 %v2810_v26, %v1526_v34  ;;  %v1487_v42 = vpop.f32.mrb[25].mxu1  ;;  %v2046_v2 = vpop.f32.mrb[33].mxu0  ;;  %v1598_v23 = vadd.f32 %v1485_v37, %v2470_v50  ;;  %v1591_v16 = vadd.f32 %v1590_v15, %v1485_v37  ;;  %v1532_v41 = vadd.f32 %v1485_v37, %v2484_v6 }
0x1be4   :  { %1535 = vrot.lane.b32.xlu1 %v1487_v42, %s2289_s0  ;;  %v1489_v14 = vpop.f32.mrb[26].mxu1  ;;  %v1529_v9 = vpop.f32.mrb[34].mxu0  ;;  %v1533_v31 = vadd.f32 %v1487_v42, %v2484_v6 }
0x1be5   :  { %v1490_v47 = vpop.f32.mrb[27].mxu1  ;;  %1554 = vrot.lane.b32.xlu0 %v1552_v4, %s2287_s22  ;;  %v2047_v60 = vpop.f32.mrb[35].mxu0  ;;  %v1901_v18 = vmul.f32 -1.442695, %v1591_v16 }
0x1be7   :  { %2194 = vpow2.f32 %v1901_v18 }
0x1be8   :  { %1600 = vrot.lane.b32.xlu1 %v1598_v23, %s2286_s21 }
0x1bf1   :  { %v2195_v17 = vpop.eup %2194 }
0x1bf2   :  { %v1595_v1 = vadd.f32 1.0, %v2195_v17 }
0x1bf4   :  { %2196 = vrcp.f32 %v1595_v1 }
0x1bfe   :  { %v2197_v24 = vpop.eup %2196 }
0x1c56   :  { %v1536_v7 = vpop.permute.xlu1 %1535 }
0x1c57   :  { %v1538_v11 = vadd.f32 %v1536_v7, %v1532_v41  ;;  %v1555_v20 = vpop.permute.xlu0 %1554  ;;  %v1539_v8 = vadd.f32 %v1536_v7, %v1533_v31 }
0x1c59   :  { %v1899_v21 = vmul.f32 -1.442695, %v1538_v11  ;;  %v1900_v38 = vmul.f32 -1.442695, %v1539_v8 }
0x1c5a   :  { %v1601_v25 = vpop.permute.xlu1 %1600 }
0x1c5b   :  { %2198 = vpow2.f32 %v1899_v21  ;;  %v1603_v50 = vmul.f32 %v2197_v24, %v1601_v25 }
0x1c5d   :  { %1605 = vrot.lane.b32.xlu1 %v1603_v50, %s2286_s21 }
0x1c65   :  { %v2199_v27 = vpop.eup %2198 }
0x1c66   :  { %v1546_v28 = vadd.f32 1.0, %v2199_v27 }
0x1c68   :  { %2200 = vrcp.f32 %v1546_v28 }
0x1c72   :  { %v2201_v43 = vpop.eup %2200 }
0x1c73   :  { %v1557_v30 = vmul.f32 %v2201_v43, %v1555_v20 }
0x1c75   :  { %1559 = vrot.lane.b32.xlu0 %v1557_v30, %s2286_s21 }
0x1ccf   :  { %v1606_v3 = vpop.permute.xlu1 %1605 }
0x1cd0   :  { %v1608_v32 = vadd.f32 %v1606_v3, %v1590_v15 }
0x1cd2   :  { %2202 = vtanh.f32 %v1608_v32 }
0x1cdc   :  { %v2203_v36 = vpop.eup %2202 }
0x1cdd   :  { %1611 = vrot.lane.b32.xlu1 %v2203_v36, %s2286_s21 }
0x1ce7   :  { %v1560_v19 = vpop.permute.xlu0 %1559 }
0x1ce8   :  { %v1562_v22 = vadd.f32 %v1560_v19, %v1533_v31 }
0x1cea   :  { %2204 = vtanh.f32 %v1562_v22 }
0x1ceb   :  { %2206 = vpow2.f32 %v1900_v38 }
0x1cf4   :  { %v2205_v44 = vpop.eup %2204 }
0x1cf5   :  { %1565 = vrot.lane.b32.xlu0 %v2205_v44, %s2287_s22  ;;  %v2207_v40 = vpop.eup %2206 }
0x1cf6   :  { %v1547_v46 = vadd.f32 1.0, %v2207_v40 }
0x1cf8   :  { %2208 = vrcp.f32 %v1547_v46 }
0x1d02   :  { %v2209_v51 = vpop.eup %2208 }
0x1d4f   :  { %v1612_v55 = vpop.permute.xlu1 %1611 }
0x1d50   :  { %v1614_v39 = vsub.f32 %v2843_v62, %v1612_v55 }
0x1d52   :  { %1616 = vrot.lane.b32.xlu0 %v1614_v39, %s2289_s0 }
0x1d67   :  { %v1566_v48 = vpop.permute.xlu0 %1565 }
0x1d68   :  { %v1568_v49 = vsub.f32 %v2838_v59, %v1566_v48 }
0x1d6a   :  { %v1569_v52 = vmul.f32 %v2209_v51, %v1568_v49 }
0x1d6c   :  { %1571 = vrot.lane.b32.xlu1 %v1569_v52, %s2289_s0 }
0x1d70   :  { %1626 = vrot.lane.b32.xlu1 %v2843_v62, %s2286_s21 }
0x1dc4   :  { %v1617_v53 = vpop.permute.xlu0 %1616 }
0x1dc5   :  { %v1619_v13 = vmul.f32 %v2197_v24, %v1617_v53 }
0x1dc7   :  { %1621 = vrot.lane.b32.xlu0 %v1619_v13, %s2289_s0 }
0x1dde   :  { %v1572_v57 = vpop.permute.xlu1 %1571 }
0x1ddf   :  { %v1574_v58 = vadd.f32 %v2205_v44, %v1572_v57 }
0x1de1   :  { %v1575_v12 = vsub.f32 %v1574_v58, %v2845_v61 }
0x1de2   :  { %v1627_v63 = vpop.permute.xlu1 %1626 }
0x1de3   :  { %1577 = vrot.lane.b32.xlu0 %v1575_v12, %s2289_s0 }
0x1e39   :  { %v1622_v5 = vpop.permute.xlu0 %1621 }
0x1e3a   :  { %v1624_v35 = vadd.f32 %v2203_v36, %v1622_v5 }
0x1e3c   :  { %v1629_v45 = vsub.f32 %v1624_v35, %v1627_v63 }
0x1e3e   :  { %1631 = vrot.lane.b32.xlu1 %v1629_v45, %s2289_s0 }
0x1e55   :  { %v1578_v37 = vpop.permute.xlu0 %1577 }
0x1e56   :  { %v1580_v34 = vmul.f32 %v1578_v37, %v2689_v33 }
0x1e58   :  { %1582 = vrot.lane.b32.xlu0 %v1580_v34, %s2286_s21 }
0x1eb0   :  { %v1632_v4 = vpop.permute.xlu1 %1631 }
0x1eb1   :  { %v1634_v42 = vmul.f32 %v1632_v4, %v2689_v33 }
0x1eb3   :  { %1636 = vrot.lane.b32.xlu1 %v1634_v42, %s2289_s0 }
0x1eca   :  { %v1583_v2 = vpop.permute.xlu0 %1582 }
0x1ecb   :  { %v2897_v61 = vadd.f32 %v1583_v2, %v2838_v59 }
0x1ecd   :  { %1641 = vrot.lane.b32.xlu0 %v2897_v61, %s2289_s0 }
0x1f25   :  { %v1637_v14 = vpop.permute.xlu1 %1636 }
0x1f26   :  { %v2902_v9 = vadd.f32 %v1637_v14, %v2843_v62 }
0x1f3f   :  { %v1642_v47 = vpop.permute.xlu0 %1641 }
0x1f40   :  { %v1644_v60 = vsel %vm107_vm0, %v2902_v9, %v1642_v47 }
0x1f41   :  { %v1645_v23 = vpack.c.bf16 %v1644_v60, %v1644_v60 }
0x1f43   :  { %1902 = vmatmul.mubr.msk.bf16.vlgmr.msra.gmra.mrb[28].mxu1 %vm284_vm2, %v1645_v23  ;;  %2057 = vmatmul.mubr.msk.bf16.vlgmr.msra.gmra.mrb[36].mxu0 %vm284_vm2, %v1645_v23 }
0x2016   :  { %v1683_v15 = vpop.f32.mrb[28].mxu1  ;;  %v1724_v16 = vpop.f32.mrb[36].mxu0 }
0x2017   :  { %v1750_v18 = vadd.f32 %v2810_v26, %v1724_v16  ;;  %v1685_v17 = vpop.f32.mrb[29].mxu1  ;;  %v2058_v1 = vpop.f32.mrb[37].mxu0  ;;  %v1730_v21 = vadd.f32 %v1683_v15, %v2484_v6  ;;  %v1200_v15 = vmul.f32 %v2751_v29, %v2689_v33 }
0x2018   :  { %1733 = vrot.lane.b32.xlu1 %v1685_v17, %s2289_s0  ;;  %v1687_v41 = vpop.f32.mrb[30].mxu1  ;;  %v1727_v62 = vpop.f32.mrb[38].mxu0  ;;  %v1731_v30 = vadd.f32 %v1685_v17, %v2484_v6  ;;  %v2234_v6 = vld [vmem:[%s2970_s1] sm:$0xff]  ;;  %s2292_s1 = smov [#allocation5]  }
0x2019   :  { %v1688_v7 = vpop.f32.mrb[31].mxu1  ;;  %1752 = vrot.lane.b32.xlu0 %v1750_v18, %s2287_s22  ;;  %v2059_v11 = vpop.f32.mrb[39].mxu0  ;;  %v422_v42 = vmul.f32 %v2234_v6, %v2502_v10  ;;  %s1833_s15 = sshll.u32 %s2292_s1, 4  ;;  %s1834_s15 = int_to_ptr.vmem [resolvable:$true] %s1833_s15 }
0x201a   :  { %s2257_s16 = scalar_lea.vmem %s1834_s15, 384  ;;  %p2262_p9 = scmp.lt.s32.totalorder %s1834_s15, %s1834_s15 }
0x201b   :  { %p2258_p8 = scmp.ne.s32.totalorder %s1834_s15, %s2257_s16  ;;  %p2263_p10 = scmp.lt.s32.totalorder %s2257_s16, %s2257_s16 }
0x201d   :  { %p2264_p11 = por %p2263_p10, %p2262_p9 }
0x201f   :  { %p2265_p12 = pnand %p2264_p11, %p2258_p8 }
0x208a   :  { %v1734_v24 = vpop.permute.xlu1 %1733 }
0x208b   :  { %v1736_v25 = vadd.f32 %v1734_v24, %v1730_v21  ;;  %v1753_v43 = vpop.permute.xlu0 %1752  ;;  %v1737_v31 = vadd.f32 %v1734_v24, %v1731_v30 }
0x208d   :  { %v1904_v50 = vmul.f32 -1.442695, %v1736_v25  ;;  %v1905_v19 = vmul.f32 -1.442695, %v1737_v31 }
0x208f   :  { %2210 = vpow2.f32 %v1904_v50 }
0x2099   :  { %v2211_v27 = vpop.eup %2210 }
0x209a   :  { %v1744_v28 = vadd.f32 1.0, %v2211_v27 }
0x209c   :  { %2212 = vrcp.f32 %v1744_v28 }
0x20a6   :  { %v2213_v26 = vpop.eup %2212 }
0x20a7   :  { %v1755_v20 = vmul.f32 %v2213_v26, %v1753_v43 }
0x20a9   :  { %1757 = vrot.lane.b32.xlu1 %v1755_v20, %s2286_s21 }
0x211b   :  { %v1758_v3 = vpop.permute.xlu1 %1757 }
0x211c   :  { %v1760_v32 = vadd.f32 %v1758_v3, %v1731_v30 }
0x211e   :  { %2214 = vtanh.f32 %v1760_v32 }
0x211f   :  { %2216 = vpow2.f32 %v1905_v19 }
0x2128   :  { %v2215_v36 = vpop.eup %2214 }
0x2129   :  { %1763 = vrot.lane.b32.xlu0 %v2215_v36, %s2287_s22  ;;  %v2217_v22 = vpop.eup %2216 }
0x212a   :  { %v1745_v44 = vadd.f32 1.0, %v2217_v22 }
0x212c   :  { %2218 = vrcp.f32 %v1745_v44 }
0x2136   :  { %v2219_v55 = vpop.eup %2218 }
0x219b   :  { %v1764_v8 = vpop.permute.xlu0 %1763 }
0x219c   :  { %v1766_v38 = vsub.f32 %v2897_v61, %v1764_v8 }
0x219e   :  { %v1767_v39 = vmul.f32 %v2219_v55, %v1766_v38 }
0x21a0   :  { %1769 = vrot.lane.b32.xlu1 %v1767_v39, %s2289_s0 }
0x21a4   :  { %618 = vrot.lane.b32.xlu1 %v2234_v6, %s2287_s22 }
0x21a8   :  { %1586 = vrot.lane.b32.xlu1 %v2689_v33, %s2286_s21 }
0x2212   :  { %v1770_v40 = vpop.permute.xlu1 %1769 }
0x2213   :  { %v1772_v46 = vadd.f32 %v2215_v36, %v1770_v40 }
0x2215   :  { %v1773_v48 = vsub.f32 %v1772_v46, %v1642_v47 }
0x2216   :  { %v619_v49 = vpop.permute.xlu1 %618 }
0x2217   :  { %1775 = vrot.lane.b32.xlu0 %v1773_v48, %s2286_s21  ;;  %v621_v51 = vmul.f32 %v619_v49, %v2562_v54 }
0x221a   :  { %v1587_v5 = vpop.permute.xlu1 %1586 }
0x221b   :  { %1392 = vrot.lane.b32.xlu0 %v2689_v33, %s2287_s22  ;;  %v1589_v35 = vmul.f32 %v1587_v5, %v2897_v61 }
0x221f   :  { %812 = vrot.lane.b32.xlu0 %v2234_v6, %s2286_s21 }
0x2223   :  { %1010 = vrot.lane.b32.xlu0 %v2234_v6, %s2289_s0 }
0x2227   :  { %1789 = vrot.lane.b32.xlu0 %v621_v51, %s2289_s0 }
0x2289   :  { %v1776_v52 = vpop.permute.xlu0 %1775 }
0x228a   :  { %v1778_v53 = vmul.f32 %v1776_v52, %v2689_v33 }
0x228c   :  { %1780 = vrot.lane.b32.xlu1 %v1778_v53, %s2289_s0 }
0x228d   :  { %v1393_v13 = vpop.permute.xlu0 %1392 }
0x228e   :  { %v1395_v58 = vmul.f32 %v1393_v13, %v2838_v59 }
0x2290   :  { %1784 = vrot.lane.b32.xlu1 %v2689_v33, %s2289_s0 }
0x2291   :  { %v813_v57 = vpop.permute.xlu0 %812 }
0x2292   :  { %v815_v12 = vmul.f32 %v813_v57, %v2623_v56 }
0x2294   :  { %1806 = vrot.lane.b32.xlu1 %v1395_v58, %s2289_s0  ;;  %1793 = vrot.lane.b32.xlu0 %v815_v12, %s2286_s21 }
0x2295   :  { %v1011_v54 = vpop.permute.xlu0 %1010 }
0x2296   :  { %v1013_v63 = vmul.f32 %v1011_v54, %v2682_v0 }
0x2298   :  { %1797 = vrot.lane.b32.xlu0 %v1013_v63, %s2287_s22  ;;  %1810 = vrot.lane.b32.xlu1 %v1589_v35, %s2286_s21 }
0x2299   :  { %v1790_v56 = vpop.permute.xlu0 %1789 }
0x229a   :  { %v1800_v0 = vsel %vm107_vm0, %v422_v42, %v1790_v56 }
0x22fe   :  { %v1781_v45 = vpop.permute.xlu1 %1780 }
0x22ff   :  { %v1783_v37 = vadd.f32 %v1781_v45, %v2897_v61 }
0x2301   :  { %1822 = vrot.lane.b32.xlu0 %v1783_v37, %s2289_s0 }
0x2302   :  { %v1785_v59 = vpop.permute.xlu1 %1784 }
0x2303   :  { %v1787_v34 = vmul.f32 %v1785_v59, %v1783_v37 }
0x2305   :  { %1814 = vrot.lane.b32.xlu1 %v1787_v34, %s2287_s22 }
0x2306   :  { %v1794_v4 = vpop.permute.xlu0 %1793  ;;  %v1807_v61 = vpop.permute.xlu1 %1806 }
0x2307   :  { %v1801_v2 = vsel %vm284_vm2, %v1800_v0, %v1794_v4  ;;  %v1817_v10 = vsel %vm107_vm0, %v1200_v15, %v1807_v61 }
0x230a   :  { %v1798_v14 = vpop.permute.xlu0 %1797  ;;  %v1811_v60 = vpop.permute.xlu1 %1810 }
0x230b   :  { %v1803_v47 = vsel %vm1802_vm3, %v1801_v2, %v1798_v14  ;;  %v1818_v18 = vsel %vm284_vm2, %v1817_v10, %v1811_v60 }
0x230c   :  { %1804 = vst [vmem:[#allocation5] sm:$0xff] %v1803_v47 }
0x2373   :  { %v1823_v23 = vpop.permute.xlu0 %1822 }
0x2374   :  { %v1825_v16 = vsel %vm107_vm0, %v2902_v9, %v1823_v23 }
0x2375   :  { %1826 = vst.msk [vmem:[#allocation5 + $0x10] sm:$0xff] %vm284_vm2, %v1825_v16 }
0x2377   :  { %v1815_v17 = vpop.permute.xlu1 %1814 }
0x2378   :  { %v1819_v1 = vsel %vm1802_vm3, %v1818_v18, %v1815_v17 }
0x2379   :  { %1820 = vst [vmem:[#allocation5 + $0x8] sm:$0xff] %v1819_v1 }
0x237a   :  { %2268 = shalt.err (!%p2265_p12)
}
0x237b   :  { %s2269_s18 = scalar_lea.hbm %s2975_s6, 384 }
0x237c   :  { %p2270_p13 = scmp.ne.s32.totalorder %s2975_s6, %s2269_s18  ;;  %p2273_p0 = scmp.lt.u32.totalorder %s2269_s18, %s2975_s6 }
0x237e   :  { %p2275_p1 = pnand %p2273_p0, %p2270_p13 }
0x2380   :  { %2278 = shalt.err (!%p2275_p1)
}
0x2381   :  { %1836 = dma.vmem_to_hbm [thread:$0]  %s1834_s15, 384, %s2975_s6, [#allocation4]  }
0x2382   :  { %2281 = dma.done.wait [#allocation4], 384  }
0x2383   :  { %2282 = vsyncadd [#allocation4], 4294966912 }
0x2384   :  { %1840 = vsyncpa [#allocation3], 1 }
0x2385   :  { %1841 = vsyncpa [#allocation4], 1 }

</bundles_post_ra>
